<compile_context>
chip_gen: v6e
topology: v6e:2x2x1
jax: 0.10.0
libtpu: 0.0.40
codegen_flags: <defaults>
</compile_context>

<pallas_src>
import functools

import jax
import jax.numpy as jnp
from jax.experimental import pallas as pl
from jax.experimental.pallas import tpu as pltpu


# ----------------------------------------------------------------------------
# helpers
# ----------------------------------------------------------------------------
def _layernorm(y, gamma, beta, eps=1e-5):
    mu = jnp.mean(y, axis=-1, keepdims=True)
    var = jnp.mean((y - mu) ** 2, axis=-1, keepdims=True)
    return (y - mu) * jax.lax.rsqrt(var + eps) * gamma + beta


def _seq_tile(S, preferred):
    """Largest power-of-two tile <= preferred that divides S (or S itself)."""
    if S <= preferred:
        return S
    t = preferred
    while t >= 8:
        if S % t == 0:
            return t
        t //= 2
    return S


_BUFFERED_WEIGHTS_OK = None


def _single_buffer_supported():
    """Probe once whether pl.Buffered(1) (single-buffered constant operands)
    is supported by the installed Pallas/Mosaic; fall back cleanly if not."""
    global _BUFFERED_WEIGHTS_OK
    if _BUFFERED_WEIGHTS_OK is None:
        try:
            def k(x_ref, o_ref):
                o_ref[...] = x_ref[...] + 1.0

            spec = pl.BlockSpec((8, 128), lambda i: (0, 0),
                                pipeline_mode=pl.Buffered(1))
            f = pl.pallas_call(
                k,
                out_shape=jax.ShapeDtypeStruct((8, 128), jnp.float32),
                grid=(1,),
                in_specs=[spec],
                out_specs=pl.BlockSpec((8, 128), lambda i: (0, 0)),
            )
            jax.block_until_ready(f(jnp.zeros((8, 128), jnp.float32)))
            _BUFFERED_WEIGHTS_OK = True
        except Exception:
            _BUFFERED_WEIGHTS_OK = False
    return _BUFFERED_WEIGHTS_OK


# ----------------------------------------------------------------------------
# kernel: one full encoder layer for one (batch, query-tile) grid point
# ----------------------------------------------------------------------------
def encoder_layer_kernel(
    xq_ref, xf_ref,
    wq_ref, bq_ref, wkv_ref, bkv_ref, wo_ref, bo_ref,
    g1_ref, be1_ref,
    w1_ref, b1_ref, w2_ref, b2_ref,
    g2_ref, be2_ref,
    out_ref,
    *, nb_heads, kv_tile,
):
    f32 = jnp.float32
    cdt = jnp.bfloat16                       # matmul-operand dtype

    xq = xq_ref[0]                           # (tS, D)  query-tile rows (bf16)
    xf = xf_ref[0]                           # (S,  D)  full sequence   (bf16)
    tS, D = xq.shape
    S = xf.shape[0]
    H = nb_heads
    dk = D // H
    scale = 1.0 / float(dk) ** 0.5

    # ---- head-batched projections (weights pre-split per head) -------------
    # Q only for the query tile; K and V fused along the head axis into one
    # batched MXU pass over the full sequence (first H "heads" = K, last = V).
    xq_b = jnp.broadcast_to(xq.astype(cdt), (H, tS, D))
    q = jnp.einsum("hsd,hdf->hsf", xq_b, wq_ref[...],
                   preferred_element_type=f32) + bq_ref[...]
    q = (q * scale).astype(cdt)              # (H, tS, dk)

    xf_b = jnp.broadcast_to(xf.astype(cdt), (2 * H, S, D))
    kv = jnp.einsum("hsd,hdf->hsf", xf_b, wkv_ref[...],
                    preferred_element_type=f32) + bkv_ref[...]
    kv = kv.astype(cdt)                      # (2H, S, dk)
    k = kv[:H]                               # (H, S, dk)  leading-dim slice
    v = kv[H:]                               # (H, S, dk)

    # ---- attention: online softmax over KV tiles (flash style) -------------
    n_kv = S // kv_tile
    m = jnp.full((H, tS, 1), -jnp.inf, f32)
    l = jnp.zeros((H, tS, 1), f32)
    acc = jnp.zeros((H, tS, dk), f32)
    for t in range(n_kv):                    # static, unrolled
        kt = k[:, t * kv_tile:(t + 1) * kv_tile, :]
        vt = v[:, t * kv_tile:(t + 1) * kv_tile, :]
        s = jnp.einsum("hqd,hkd->hqk", q, kt,
                       preferred_element_type=f32)       # (H, tS, kv_tile)
        m_new = jnp.maximum(m, jnp.max(s, axis=-1, keepdims=True))
        alpha = jnp.exp(m - m_new)
        p = jnp.exp(s - m_new)
        l = alpha * l + jnp.sum(p, axis=-1, keepdims=True)
        acc = alpha * acc + jnp.einsum("hqk,hkd->hqd", p.astype(cdt), vt,
                                       preferred_element_type=f32)
        m = m_new
    ctx = acc * pl.reciprocal(l, approx=True)            # (H, tS, dk) f32

    # ---- output projection: per-head partials, summed over heads -----------
    part = jnp.einsum("hqd,hde->hqe", ctx.astype(cdt), wo_ref[...],
                      preferred_element_type=f32)        # (H, tS, D)
    attn = jnp.sum(part, axis=0) + bo_ref[...]           # (tS, D) f32

    # ---- residual + LayerNorm 1 (dropout = identity at inference) ----------
    y = _layernorm(xq.astype(f32) + attn, g1_ref[...], be1_ref[...])

    # ---- position-wise feed-forward -----------------------------------------
    h1 = jnp.dot(y.astype(cdt), w1_ref[...],
                 preferred_element_type=f32) + b1_ref[...]
    h1 = jnp.maximum(h1, 0.0)
    ff = jnp.dot(h1.astype(cdt), w2_ref[...],
                 preferred_element_type=f32) + b2_ref[...]

    z = _layernorm(y + ff, g2_ref[...], be2_ref[...])
    out_ref[0] = z.astype(out_ref.dtype)


# ----------------------------------------------------------------------------
# wrapper
# ----------------------------------------------------------------------------
def _vmem_limit_bytes(params, S, D, F, H, tS, kvt):
    dk = D // H
    w_bytes = sum(int(p.size) * p.dtype.itemsize for p in params)
    act_bytes = 2 * (S * D + 2 * tS * D)                        # bf16 in/out blocks
    inter = 4 * (3 * H * S * dk + 4 * H * tS * dk + H * tS * kvt
                 + H * tS * D + tS * F + 6 * tS * D)            # f32 temporaries
    inter += 2 * (2 * H * S * D + H * tS * D)                   # bf16 broadcasts
    est = 2 * (w_bytes + act_bytes) + inter                     # 2x: double-buffered DMA
    return int(min(max(2 * est, 32 * 1024 * 1024), 64 * 1024 * 1024))


def _cost_estimate(params, B, S, D, F, H, tS):
    dk = D // H
    nq = S // tS
    flops_per_step = (2 * tS * D * D            # Q projection
                      + 4 * S * D * D           # fused K/V projection
                      + 4 * H * tS * S * dk     # scores + context
                      + 2 * tS * D * D          # output projection
                      + 4 * tS * D * F)         # FFN
    flops = B * nq * flops_per_step
    transcendentals = B * nq * (H * tS * S + tS * D)
    w_bytes = sum(int(p.size) * p.dtype.itemsize for p in params)
    bytes_accessed = B * nq * (S * D + 2 * tS * D) * 2 + B * nq * w_bytes
    return pl.CostEstimate(flops=int(flops),
                           transcendentals=int(transcendentals),
                           bytes_accessed=int(bytes_accessed))


def encoder_layer(x, params, nb_heads):
    """x: (B, S, D) bf16 activations; params: per-layer weight list."""
    B, S, D = x.shape
    assert D % nb_heads == 0, "d_model must be divisible by nb_heads"
    F = params[8].shape[1]                    # W1: (D, F)

    tS = _seq_tile(S, 128)                    # query tile
    kvt = _seq_tile(S, 512)                   # KV tile for the online softmax
    single_buffer = _single_buffer_supported()

    def const_spec(p):
        idx = lambda b, q, _nd=p.ndim: (0,) * _nd   # noqa: E731
        if single_buffer:
            # Constant block index across the whole grid -> 1 buffer suffices
            # (halves weight VMEM; matters on v7x's 64 MiB).
            return pl.BlockSpec(p.shape, idx, pipeline_mode=pl.Buffered(1))
        return pl.BlockSpec(p.shape, idx)

    in_specs = [
        pl.BlockSpec((1, tS, D), lambda b, q: (b, q, 0)),   # query-tile rows
        pl.BlockSpec((1, S, D), lambda b, q: (b, 0, 0)),    # full sequence (K/V)
    ] + [const_spec(p) for p in params]

    return pl.pallas_call(
        functools.partial(encoder_layer_kernel, nb_heads=nb_heads, kv_tile=kvt),
        out_shape=jax.ShapeDtypeStruct((B, S, D), x.dtype),
        grid_spec=pltpu.PrefetchScalarGridSpec(
            num_scalar_prefetch=0,
            grid=(B, S // tS),
            in_specs=in_specs,
            out_specs=pl.BlockSpec((1, tS, D), lambda b, q: (b, q, 0)),
        ),
        compiler_params=pltpu.CompilerParams(
            dimension_semantics=("parallel", "parallel"),
            vmem_limit_bytes=_vmem_limit_bytes(params, S, D, F, nb_heads, tS, kvt),
        ),
        cost_estimate=_cost_estimate(params, B, S, D, F, nb_heads, tS),
    )(x, x, *params)


def make_layer_params(key, d_model, nb_neurons, nb_heads):
    """Deterministic synthetic parameters for one encoder layer.

    Matmul weights are stored in bf16 (MXU operand dtype); biases / LayerNorm
    parameters stay f32 (added to f32 accumulators).  Q/K/V projections are
    pre-split per head: Wq (H, D, dk); K and V fused as (2H, D, dk)."""
    D, F, H = d_model, nb_neurons, nb_heads
    dk = D // H
    ks = jax.random.split(key, 5)
    std = 0.05
    wdt = jnp.bfloat16

    def w(k, shape):
        return (jax.random.normal(k, shape, jnp.float32) * std).astype(wdt)

    params = [
        w(ks[0], (H, D, dk)), jnp.zeros((H, 1, dk), jnp.float32),          # Wq, bq
        w(ks[1], (2 * H, D, dk)), jnp.zeros((2 * H, 1, dk), jnp.float32),  # Wkv, bkv
        w(ks[2], (H, dk, D)), jnp.zeros((1, D), jnp.float32),              # Wo, bo
        jnp.ones((1, D), jnp.float32), jnp.zeros((1, D), jnp.float32),     # LN1
        w(ks[3], (D, F)), jnp.zeros((1, F), jnp.float32),                  # W1, b1
        w(ks[4], (F, D)), jnp.zeros((1, D), jnp.float32),                  # W2, b2
        jnp.ones((1, D), jnp.float32), jnp.zeros((1, D), jnp.float32),     # LN2
    ]
    return params


def encoder_forward(x, layer_params, nb_heads):
    out = x.astype(jnp.bfloat16)              # bf16 activations between layers
    for params in layer_params:
        out = encoder_layer(out, params, nb_heads)
    return out.astype(jnp.float32)            # keep the module's f32 interface


# ----------------------------------------------------------------------------
# pure-JAX reference (same dtype discipline as the kernel) for validation
# ----------------------------------------------------------------------------
def encoder_layer_ref(x, params, nb_heads):
    (wq, bq, wkv, bkv, wo, bo, g1, be1, w1, b1, w2, b2, g2, be2) = params
    f32, bf16 = jnp.float32, jnp.bfloat16
    H = nb_heads
    D = x.shape[-1]
    dk = D // H
    scale = 1.0 / float(dk) ** 0.5
    xb = x.astype(bf16)

    q = jnp.einsum("bsd,hdf->bhsf", xb, wq, preferred_element_type=f32) + bq
    q = (q * scale).astype(bf16)
    kv = jnp.einsum("bsd,hdf->bhsf", xb, wkv, preferred_element_type=f32) + bkv
    kv = kv.astype(bf16)
    k, v = kv[:, :H], kv[:, H:]

    s = jnp.einsum("bhqd,bhkd->bhqk", q, k, preferred_element_type=f32)
    p = jax.nn.softmax(s, axis=-1)
    ctx = jnp.einsum("bhqk,bhkd->bhqd", p.astype(bf16), v,
                     preferred_element_type=f32)
    attn = jnp.einsum("bhqd,hde->bqe", ctx.astype(bf16), wo,
                      preferred_element_type=f32) + bo

    y = _layernorm(x.astype(f32) + attn, g1, be1)
    h1 = jnp.maximum(jnp.dot(y.astype(bf16), w1, preferred_element_type=f32) + b1, 0.0)
    ff = jnp.dot(h1.astype(bf16), w2, preferred_element_type=f32) + b2
    z = _layernorm(y + ff, g2, be2)
    return z.astype(x.dtype)


def encoder_forward_ref(x, layer_params, nb_heads):
    out = x.astype(jnp.bfloat16)
    for params in layer_params:
        out = encoder_layer_ref(out, params, nb_heads)
    return out.astype(jnp.float32)


if __name__ == "__main__":
    # Small shapes consistent with the Encoder forward:
    # nb_texts=2, nb_tokens=8, d_model=32, nb_heads=4, nb_neurons=64, nb_layers=2
    B, S, D, H, F, L = 2, 8, 32, 4, 64, 2

    key = jax.random.PRNGKey(0)
    kx, *klayers = jax.random.split(key, L + 1)
    x = jax.random.normal(kx, (B, S, D), jnp.float32)

    layer_params = [make_layer_params(k, D, F, H) for k in klayers]

    out = jax.block_until_ready(encoder_forward(x, layer_params, H))

    assert out.shape == (B, S, D) and out.dtype == jnp.float32
    assert bool(jnp.all(jnp.isfinite(out)))

    # Correctness gate against the pure-JAX reference.
    ref = jax.block_until_ready(encoder_forward_ref(x, layer_params, H))
    max_err = float(jnp.max(jnp.abs(out - ref)))
    assert max_err < 5e-2, f"kernel/reference mismatch: max abs err = {max_err}"

    print("KERNEL_OK")
</pallas_src>

<mosaic_0001>
module attributes {stable_mosaic.version = 11 : i64} {
  func.func @k(%arg0: i32, %arg1: memref<8x128xf32, #tpu.memory_space<vmem>>, %arg2: memref<8x128xf32, #tpu.memory_space<vmem>>) attributes {dimension_semantics = [#tpu.dimension_semantics<arbitrary>], iteration_bounds = array<i64: 1>, scalar_prefetch = 0 : i64, scratch_operands = 0 : i64, tpu.core_type = #tpu.core_type<tc>, window_params = [{pipeline_mode = #tpu.pipeline_mode<synchronous>, transform_indices = @transform_0, window_bounds = array<i64: 8, 128>}, {pipeline_mode = #tpu.pipeline_mode<synchronous>, transform_indices = @transform_1, window_bounds = array<i64: 8, 128>}]} {
    %c0 = arith.constant 0 : index
    %c0_0 = arith.constant 0 : index
    %0 = vector.load %arg1[%c0, %c0_0] : memref<8x128xf32, #tpu.memory_space<vmem>>, vector<8x128xf32>
    %cst = arith.constant 1.000000e+00 : f32
    %1 = vector.broadcast %cst : f32 to vector<8x128xf32>
    %2 = arith.addf %0, %1 : vector<8x128xf32>
    %c0_1 = arith.constant 0 : index
    %c0_2 = arith.constant 0 : index
    %3 = vector.load %arg2[%c0_1, %c0_2] : memref<8x128xf32, #tpu.memory_space<vmem>>, vector<8x128xf32>
    tpu.vector_store %arg2[%c0_1, %c0_2], %2 {strides = array<i32>} : memref<8x128xf32, #tpu.memory_space<vmem>>, vector<8x128xf32>,
    return
  }
  func.func @transform_0(%arg0: i32) -> (i32, i32) {
    %c0_i32 = arith.constant 0 : i32
    %c0_i32_0 = arith.constant 0 : i32
    %c0_i32_1 = arith.constant 0 : i32
    return %c0_i32, %c0_i32_0 : i32, i32
  }
  func.func @transform_1(%arg0: i32) -> (i32, i32) {
    %c0_i32 = arith.constant 0 : i32
    %c0_i32_0 = arith.constant 0 : i32
    %c0_i32_1 = arith.constant 0 : i32
    return %c0_i32, %c0_i32_0 : i32, i32
  }
}

module attributes {stable_mosaic.version = 11 : i64} {
  func.func @encoder_layer_kernel(%arg0: i32, %arg1: i32, %arg2: memref<1x8x32xbf16, #tpu.memory_space<vmem>>, %arg3: memref<1x8x32xbf16, #tpu.memory_space<vmem>>, %arg4: memref<4x32x8xbf16, #tpu.memory_space<vmem>>, %arg5: memref<4x1x8xf32, #tpu.memory_space<vmem>>, %arg6: memref<8x32x8xbf16, #tpu.memory_space<vmem>>, %arg7: memref<8x1x8xf32, #tpu.memory_space<vmem>>, %arg8: memref<4x8x32xbf16, #tpu.memory_space<vmem>>, %arg9: memref<1x32xf32, #tpu.memory_space<vmem>>, %arg10: memref<1x32xf32, #tpu.memory_space<vmem>>, %arg11: memref<1x32xf32, #tpu.memory_space<vmem>>, %arg12: memref<32x64xbf16, #tpu.memory_space<vmem>>, %arg13: memref<1x64xf32, #tpu.memory_space<vmem>>, %arg14: memref<64x32xbf16, #tpu.memory_space<vmem>>, %arg15: memref<1x32xf32, #tpu.memory_space<vmem>>, %arg16: memref<1x32xf32, #tpu.memory_space<vmem>>, %arg17: memref<1x32xf32, #tpu.memory_space<vmem>>, %arg18: memref<1x8x32xbf16, #tpu.memory_space<vmem>>) attributes {dimension_semantics = [#tpu.dimension_semantics<parallel>, #tpu.dimension_semantics<parallel>], iteration_bounds = array<i64: 2, 1>, scalar_prefetch = 0 : i64, scratch_operands = 0 : i64, tpu.core_type = #tpu.core_type<tc>, window_params = [{transform_indices = @transform_0, window_bounds = array<i64: 1, 8, 32>}, {transform_indices = @transform_1, window_bounds = array<i64: 1, 8, 32>}, {pipeline_mode = #tpu.pipeline_mode<synchronous>, transform_indices = @transform_2, window_bounds = array<i64: 4, 32, 8>}, {pipeline_mode = #tpu.pipeline_mode<synchronous>, transform_indices = @transform_3, window_bounds = array<i64: 4, 1, 8>}, {pipeline_mode = #tpu.pipeline_mode<synchronous>, transform_indices = @transform_4, window_bounds = array<i64: 8, 32, 8>}, {pipeline_mode = #tpu.pipeline_mode<synchronous>, transform_indices = @transform_5, window_bounds = array<i64: 8, 1, 8>}, {pipeline_mode = #tpu.pipeline_mode<synchronous>, transform_indices = @transform_6, window_bounds = array<i64: 4, 8, 32>}, {pipeline_mode = #tpu.pipeline_mode<synchronous>, transform_indices = @transform_7, window_bounds = array<i64: 1, 32>}, {pipeline_mode = #tpu.pipeline_mode<synchronous>, transform_indices = @transform_8, window_bounds = array<i64: 1, 32>}, {pipeline_mode = #tpu.pipeline_mode<synchronous>, transform_indices = @transform_9, window_bounds = array<i64: 1, 32>}, {pipeline_mode = #tpu.pipeline_mode<synchronous>, transform_indices = @transform_10, window_bounds = array<i64: 32, 64>}, {pipeline_mode = #tpu.pipeline_mode<synchronous>, transform_indices = @transform_11, window_bounds = array<i64: 1, 64>}, {pipeline_mode = #tpu.pipeline_mode<synchronous>, transform_indices = @transform_12, window_bounds = array<i64: 64, 32>}, {pipeline_mode = #tpu.pipeline_mode<synchronous>, transform_indices = @transform_13, window_bounds = array<i64: 1, 32>}, {pipeline_mode = #tpu.pipeline_mode<synchronous>, transform_indices = @transform_14, window_bounds = array<i64: 1, 32>}, {pipeline_mode = #tpu.pipeline_mode<synchronous>, transform_indices = @transform_15, window_bounds = array<i64: 1, 32>}, {transform_indices = @transform_16, window_bounds = array<i64: 1, 8, 32>}]} {
    %c0 = arith.constant 0 : index
    %c0_0 = arith.constant 0 : index
    %c0_1 = arith.constant 0 : index
    %0 = vector.load %arg2[%c0, %c0_0, %c0_1] : memref<1x8x32xbf16, #tpu.memory_space<vmem>>, vector<1x8x32xbf16>
    %1 = vector.shape_cast %0 : vector<1x8x32xbf16> to vector<8x32xbf16>
    %c0_2 = arith.constant 0 : index
    %c0_3 = arith.constant 0 : index
    %c0_4 = arith.constant 0 : index
    %2 = vector.load %arg3[%c0_2, %c0_3, %c0_4] : memref<1x8x32xbf16, #tpu.memory_space<vmem>>, vector<1x8x32xbf16>
    %3 = vector.shape_cast %2 : vector<1x8x32xbf16> to vector<8x32xbf16>
    %4 = vector.shape_cast %1 : vector<8x32xbf16> to vector<1x8x32xbf16>
    %5 = vector.broadcast %4 : vector<1x8x32xbf16> to vector<4x8x32xbf16>
    %c0_5 = arith.constant 0 : index
    %c0_6 = arith.constant 0 : index
    %c0_7 = arith.constant 0 : index
    %6 = vector.load %arg4[%c0_5, %c0_6, %c0_7] : memref<4x32x8xbf16, #tpu.memory_space<vmem>>, vector<4x32x8xbf16>
    "tpu.trace_start"() <{level = 10 : i32, message = "hsd,hdf->hsf"}> : () -> ()
    %cst = arith.constant dense<0.000000e+00> : vector<4x8x8xf32>
    %7 = tpu.matmul %5, %6, %cst {dimension_numbers = #tpu.dot_dimension_numbers<[2], [1], [1], [2], [0, 0, 0, 1, 1, 2], [0], [0]>} : vector<4x8x32xbf16>, vector<4x32x8xbf16>, vector<4x8x8xf32> -> vector<4x8x8xf32>
    "tpu.trace_stop"() : () -> ()
    %c0_8 = arith.constant 0 : index
    %c0_9 = arith.constant 0 : index
    %c0_10 = arith.constant 0 : index
    %8 = vector.load %arg5[%c0_8, %c0_9, %c0_10] : memref<4x1x8xf32, #tpu.memory_space<vmem>>, vector<4x1x8xf32>
    %9 = vector.broadcast %8 : vector<4x1x8xf32> to vector<4x8x8xf32>
    %10 = arith.addf %7, %9 : vector<4x8x8xf32>
    %cst_11 = arith.constant 0.353553385 : f32
    %11 = vector.broadcast %cst_11 : f32 to vector<4x8x8xf32>
    %12 = arith.mulf %10, %11 : vector<4x8x8xf32>
    %13 = arith.truncf %12 : vector<4x8x8xf32> to vector<4x8x8xbf16>
    %14 = vector.shape_cast %3 : vector<8x32xbf16> to vector<1x8x32xbf16>
    %15 = vector.broadcast %14 : vector<1x8x32xbf16> to vector<8x8x32xbf16>
    %c0_12 = arith.constant 0 : index
    %c0_13 = arith.constant 0 : index
    %c0_14 = arith.constant 0 : index
    %16 = vector.load %arg6[%c0_12, %c0_13, %c0_14] : memref<8x32x8xbf16, #tpu.memory_space<vmem>>, vector<8x32x8xbf16>
    "tpu.trace_start"() <{level = 10 : i32, message = "hsd,hdf->hsf"}> : () -> ()
    %cst_15 = arith.constant dense<0.000000e+00> : vector<8x8x8xf32>
    %17 = tpu.matmul %15, %16, %cst_15 {dimension_numbers = #tpu.dot_dimension_numbers<[2], [1], [1], [2], [0, 0, 0, 1, 1, 2], [0], [0]>} : vector<8x8x32xbf16>, vector<8x32x8xbf16>, vector<8x8x8xf32> -> vector<8x8x8xf32>
    "tpu.trace_stop"() : () -> ()
    %c0_16 = arith.constant 0 : index
    %c0_17 = arith.constant 0 : index
    %c0_18 = arith.constant 0 : index
    %18 = vector.load %arg7[%c0_16, %c0_17, %c0_18] : memref<8x1x8xf32, #tpu.memory_space<vmem>>, vector<8x1x8xf32>
    %19 = vector.broadcast %18 : vector<8x1x8xf32> to vector<8x8x8xf32>
    %20 = arith.addf %17, %19 : vector<8x8x8xf32>
    %21 = arith.truncf %20 : vector<8x8x8xf32> to vector<8x8x8xbf16>
    %22 = vector.extract_strided_slice %21 {offsets = [0, 0, 0], sizes = [4, 8, 8], strides = [1, 1, 1]} : vector<8x8x8xbf16> to vector<4x8x8xbf16>
    %23 = vector.extract_strided_slice %21 {offsets = [4, 0, 0], sizes = [4, 8, 8], strides = [1, 1, 1]} : vector<8x8x8xbf16> to vector<4x8x8xbf16>
    %cst_19 = arith.constant 0xFF800000 : f32
    %24 = vector.broadcast %cst_19 : f32 to vector<4x8x1xf32>
    %cst_20 = arith.constant 0.000000e+00 : f32
    %25 = vector.broadcast %cst_20 : f32 to vector<4x8x1xf32>
    %cst_21 = arith.constant 0.000000e+00 : f32
    %26 = vector.broadcast %cst_21 : f32 to vector<4x8x8xf32>
    "tpu.trace_start"() <{level = 10 : i32, message = "hqd,hkd->hqk"}> : () -> ()
    %cst_22 = arith.constant dense<0.000000e+00> : vector<4x8x8xf32>
    %27 = tpu.matmul %13, %22, %cst_22 {dimension_numbers = #tpu.dot_dimension_numbers<[2], [2], [1], [1], [0, 0, 0, 1, 1, 1], [0], [0]>} : vector<4x8x8xbf16>, vector<4x8x8xbf16>, vector<4x8x8xf32> -> vector<4x8x8xf32>
    "tpu.trace_stop"() : () -> ()
    %cst_23 = arith.constant dense<0xFF800000> : vector<4x8xf32>
    %28 = vector.multi_reduction <maximumf>, %27, %cst_23 [2] : vector<4x8x8xf32> to vector<4x8xf32>
    %29 = vector.shape_cast %28 : vector<4x8xf32> to vector<4x8x1xf32>
    %30 = arith.maximumf %24, %29 : vector<4x8x1xf32>
    %31 = arith.subf %24, %30 : vector<4x8x1xf32>
    %32 = math.exp %31 : vector<4x8x1xf32>
    %33 = vector.broadcast %30 : vector<4x8x1xf32> to vector<4x8x8xf32>
    %34 = arith.subf %27, %33 : vector<4x8x8xf32>
    %35 = math.exp %34 : vector<4x8x8xf32>
    %36 = arith.mulf %32, %25 : vector<4x8x1xf32>
    %cst_24 = arith.constant dense<0.000000e+00> : vector<4x8xf32>
    %37 = vector.multi_reduction <add>, %35, %cst_24 [2] : vector<4x8x8xf32> to vector<4x8xf32>
    %38 = vector.shape_cast %37 : vector<4x8xf32> to vector<4x8x1xf32>
    %39 = arith.addf %36, %38 : vector<4x8x1xf32>
    %40 = vector.broadcast %32 : vector<4x8x1xf32> to vector<4x8x8xf32>
    %41 = arith.mulf %40, %26 : vector<4x8x8xf32>
    %42 = arith.truncf %35 : vector<4x8x8xf32> to vector<4x8x8xbf16>
    "tpu.trace_start"() <{level = 10 : i32, message = "hqk,hkd->hqd"}> : () -> ()
    %cst_25 = arith.constant dense<0.000000e+00> : vector<4x8x8xf32>
    %43 = tpu.matmul %42, %23, %cst_25 {dimension_numbers = #tpu.dot_dimension_numbers<[2], [1], [1], [2], [0, 0, 0, 1, 1, 2], [0], [0]>} : vector<4x8x8xbf16>, vector<4x8x8xbf16>, vector<4x8x8xf32> -> vector<4x8x8xf32>
    "tpu.trace_stop"() : () -> ()
    %44 = arith.addf %41, %43 : vector<4x8x8xf32>
    %45 = tpu.reciprocal %39 {approx = true} : vector<4x8x1xf32> -> vector<4x8x1xf32>
    %46 = vector.broadcast %45 : vector<4x8x1xf32> to vector<4x8x8xf32>
    %47 = arith.mulf %44, %46 : vector<4x8x8xf32>
    %48 = arith.truncf %47 : vector<4x8x8xf32> to vector<4x8x8xbf16>
    %c0_26 = arith.constant 0 : index
    %c0_27 = arith.constant 0 : index
    %c0_28 = arith.constant 0 : index
    %49 = vector.load %arg8[%c0_26, %c0_27, %c0_28] : memref<4x8x32xbf16, #tpu.memory_space<vmem>>, vector<4x8x32xbf16>
    "tpu.trace_start"() <{level = 10 : i32, message = "hqd,hde->hqe"}> : () -> ()
    %cst_29 = arith.constant dense<0.000000e+00> : vector<4x8x32xf32>
    %50 = tpu.matmul %48, %49, %cst_29 {dimension_numbers = #tpu.dot_dimension_numbers<[2], [1], [1], [2], [0, 0, 0, 1, 1, 2], [0], [0]>} : vector<4x8x8xbf16>, vector<4x8x32xbf16>, vector<4x8x32xf32> -> vector<4x8x32xf32>
    "tpu.trace_stop"() : () -> ()
    %cst_30 = arith.constant dense<0.000000e+00> : vector<8x32xf32>
    %51 = vector.multi_reduction <add>, %50, %cst_30 [0] : vector<4x8x32xf32> to vector<8x32xf32>
    %c0_31 = arith.constant 0 : index
    %c0_32 = arith.constant 0 : index
    %52 = vector.load %arg9[%c0_31, %c0_32] : memref<1x32xf32, #tpu.memory_space<vmem>>, vector<1x32xf32>
    %53 = vector.broadcast %52 : vector<1x32xf32> to vector<8x32xf32>
    %54 = arith.addf %51, %53 : vector<8x32xf32>
    %55 = arith.extf %1 : vector<8x32xbf16> to vector<8x32xf32>
    %56 = arith.addf %55, %54 : vector<8x32xf32>
    %c0_33 = arith.constant 0 : index
    %c0_34 = arith.constant 0 : index
    %57 = vector.load %arg10[%c0_33, %c0_34] : memref<1x32xf32, #tpu.memory_space<vmem>>, vector<1x32xf32>
    %c0_35 = arith.constant 0 : index
    %c0_36 = arith.constant 0 : index
    %58 = vector.load %arg11[%c0_35, %c0_36] : memref<1x32xf32, #tpu.memory_space<vmem>>, vector<1x32xf32>
    %cst_37 = arith.constant dense<0.000000e+00> : vector<8xf32>
    %59 = vector.multi_reduction <add>, %56, %cst_37 [1] : vector<8x32xf32> to vector<8xf32>
    %60 = vector.shape_cast %59 : vector<8xf32> to vector<8x1xf32>
    %cst_38 = arith.constant 3.200000e+01 : f32
    %61 = vector.broadcast %cst_38 : f32 to vector<8x1xf32>
    %62 = arith.divf %60, %61 : vector<8x1xf32>
    %63 = vector.broadcast %62 : vector<8x1xf32> to vector<8x32xf32>
    %64 = arith.subf %56, %63 : vector<8x32xf32>
    %65 = arith.mulf %64, %64 : vector<8x32xf32>
    %cst_39 = arith.constant dense<0.000000e+00> : vector<8xf32>
    %66 = vector.multi_reduction <add>, %65, %cst_39 [1] : vector<8x32xf32> to vector<8xf32>
    %67 = vector.shape_cast %66 : vector<8xf32> to vector<8x1xf32>
    %cst_40 = arith.constant 3.200000e+01 : f32
    %68 = vector.broadcast %cst_40 : f32 to vector<8x1xf32>
    %69 = arith.divf %67, %68 : vector<8x1xf32>
    %70 = vector.broadcast %62 : vector<8x1xf32> to vector<8x32xf32>
    %71 = arith.subf %56, %70 : vector<8x32xf32>
    %cst_41 = arith.constant 9.99999974E-6 : f32
    %72 = vector.broadcast %cst_41 : f32 to vector<8x1xf32>
    %73 = arith.addf %69, %72 : vector<8x1xf32>
    %74 = math.rsqrt %73 : vector<8x1xf32>
    %75 = vector.broadcast %74 : vector<8x1xf32> to vector<8x32xf32>
    %76 = arith.mulf %71, %75 : vector<8x32xf32>
    %77 = vector.broadcast %57 : vector<1x32xf32> to vector<8x32xf32>
    %78 = arith.mulf %76, %77 : vector<8x32xf32>
    %79 = vector.broadcast %58 : vector<1x32xf32> to vector<8x32xf32>
    %80 = arith.addf %78, %79 : vector<8x32xf32>
    %81 = arith.truncf %80 : vector<8x32xf32> to vector<8x32xbf16>
    %c0_42 = arith.constant 0 : index
    %c0_43 = arith.constant 0 : index
    %82 = vector.load %arg12[%c0_42, %c0_43] : memref<32x64xbf16, #tpu.memory_space<vmem>>, vector<32x64xbf16>
    %cst_44 = arith.constant dense<0.000000e+00> : vector<8x64xf32>
    %83 = tpu.matmul %81, %82, %cst_44 {dimension_numbers = #tpu.dot_dimension_numbers<[1], [0], [0], [1], [0, 0, 1, 1], [], []>} : vector<8x32xbf16>, vector<32x64xbf16>, vector<8x64xf32> -> vector<8x64xf32>
    %c0_45 = arith.constant 0 : index
    %c0_46 = arith.constant 0 : index
    %84 = vector.load %arg13[%c0_45, %c0_46] : memref<1x64xf32, #tpu.memory_space<vmem>>, vector<1x64xf32>
    %85 = vector.broadcast %84 : vector<1x64xf32> to vector<8x64xf32>
    %86 = arith.addf %83, %85 : vector<8x64xf32>
    %cst_47 = arith.constant 0.000000e+00 : f32
    %87 = vector.broadcast %cst_47 : f32 to vector<8x64xf32>
    %88 = arith.maximumf %86, %87 : vector<8x64xf32>
    %89 = arith.truncf %88 : vector<8x64xf32> to vector<8x64xbf16>
    %c0_48 = arith.constant 0 : index
    %c0_49 = arith.constant 0 : index
    %90 = vector.load %arg14[%c0_48, %c0_49] : memref<64x32xbf16, #tpu.memory_space<vmem>>, vector<64x32xbf16>
    %cst_50 = arith.constant dense<0.000000e+00> : vector<8x32xf32>
    %91 = tpu.matmul %89, %90, %cst_50 {dimension_numbers = #tpu.dot_dimension_numbers<[1], [0], [0], [1], [0, 0, 1, 1], [], []>} : vector<8x64xbf16>, vector<64x32xbf16>, vector<8x32xf32> -> vector<8x32xf32>
    %c0_51 = arith.constant 0 : index
    %c0_52 = arith.constant 0 : index
    %92 = vector.load %arg15[%c0_51, %c0_52] : memref<1x32xf32, #tpu.memory_space<vmem>>, vector<1x32xf32>
    %93 = vector.broadcast %92 : vector<1x32xf32> to vector<8x32xf32>
    %94 = arith.addf %91, %93 : vector<8x32xf32>
    %95 = arith.addf %80, %94 : vector<8x32xf32>
    %c0_53 = arith.constant 0 : index
    %c0_54 = arith.constant 0 : index
    %96 = vector.load %arg16[%c0_53, %c0_54] : memref<1x32xf32, #tpu.memory_space<vmem>>, vector<1x32xf32>
    %c0_55 = arith.constant 0 : index
    %c0_56 = arith.constant 0 : index
    %97 = vector.load %arg17[%c0_55, %c0_56] : memref<1x32xf32, #tpu.memory_space<vmem>>, vector<1x32xf32>
    %cst_57 = arith.constant dense<0.000000e+00> : vector<8xf32>
    %98 = vector.multi_reduction <add>, %95, %cst_57 [1] : vector<8x32xf32> to vector<8xf32>
    %99 = vector.shape_cast %98 : vector<8xf32> to vector<8x1xf32>
    %cst_58 = arith.constant 3.200000e+01 : f32
    %100 = vector.broadcast %cst_58 : f32 to vector<8x1xf32>
    %101 = arith.divf %99, %100 : vector<8x1xf32>
    %102 = vector.broadcast %101 : vector<8x1xf32> to vector<8x32xf32>
    %103 = arith.subf %95, %102 : vector<8x32xf32>
    %104 = arith.mulf %103, %103 : vector<8x32xf32>
    %cst_59 = arith.constant dense<0.000000e+00> : vector<8xf32>
    %105 = vector.multi_reduction <add>, %104, %cst_59 [1] : vector<8x32xf32> to vector<8xf32>
    %106 = vector.shape_cast %105 : vector<8xf32> to vector<8x1xf32>
    %cst_60 = arith.constant 3.200000e+01 : f32
    %107 = vector.broadcast %cst_60 : f32 to vector<8x1xf32>
    %108 = arith.divf %106, %107 : vector<8x1xf32>
    %109 = vector.broadcast %101 : vector<8x1xf32> to vector<8x32xf32>
    %110 = arith.subf %95, %109 : vector<8x32xf32>
    %cst_61 = arith.constant 9.99999974E-6 : f32
    %111 = vector.broadcast %cst_61 : f32 to vector<8x1xf32>
    %112 = arith.addf %108, %111 : vector<8x1xf32>
    %113 = math.rsqrt %112 : vector<8x1xf32>
    %114 = vector.broadcast %113 : vector<8x1xf32> to vector<8x32xf32>
    %115 = arith.mulf %110, %114 : vector<8x32xf32>
    %116 = vector.broadcast %96 : vector<1x32xf32> to vector<8x32xf32>
    %117 = arith.mulf %115, %116 : vector<8x32xf32>
    %118 = vector.broadcast %97 : vector<1x32xf32> to vector<8x32xf32>
    %119 = arith.addf %117, %118 : vector<8x32xf32>
    %120 = arith.truncf %119 : vector<8x32xf32> to vector<8x32xbf16>
    %c0_62 = arith.constant 0 : index
    %c0_63 = arith.constant 0 : index
    %c0_64 = arith.constant 0 : index
    %121 = vector.load %arg18[%c0_62, %c0_63, %c0_64] : memref<1x8x32xbf16, #tpu.memory_space<vmem>>, vector<1x8x32xbf16>
    %122 = vector.shape_cast %121 : vector<1x8x32xbf16> to vector<8x32xbf16>
    %123 = vector.shape_cast %120 : vector<8x32xbf16> to vector<1x8x32xbf16>
    tpu.vector_store %arg18[%c0_62, %c0_63, %c0_64], %123 {strides = array<i32>} : memref<1x8x32xbf16, #tpu.memory_space<vmem>>, vector<1x8x32xbf16>,
    return
  }
  func.func @transform_0(%arg0: i32, %arg1: i32) -> (i32, i32, i32) {
    %c0_i32 = arith.constant 0 : i32
    %c0_i32_0 = arith.constant 0 : i32
    return %arg0, %arg1, %c0_i32 : i32, i32, i32
  }
  func.func @transform_1(%arg0: i32, %arg1: i32) -> (i32, i32, i32) {
    %c0_i32 = arith.constant 0 : i32
    %c0_i32_0 = arith.constant 0 : i32
    %c0_i32_1 = arith.constant 0 : i32
    return %arg0, %c0_i32, %c0_i32_0 : i32, i32, i32
  }
  func.func @transform_2(%arg0: i32, %arg1: i32) -> (i32, i32, i32) {
    %c0_i32 = arith.constant 0 : i32
    %c0_i32_0 = arith.constant 0 : i32
    %c0_i32_1 = arith.constant 0 : i32
    %c0_i32_2 = arith.constant 0 : i32
    return %c0_i32, %c0_i32_0, %c0_i32_1 : i32, i32, i32
  }
  func.func @transform_3(%arg0: i32, %arg1: i32) -> (i32, i32, i32) {
    %c0_i32 = arith.constant 0 : i32
    %c0_i32_0 = arith.constant 0 : i32
    %c0_i32_1 = arith.constant 0 : i32
    %c0_i32_2 = arith.constant 0 : i32
    return %c0_i32, %c0_i32_0, %c0_i32_1 : i32, i32, i32
  }
  func.func @transform_4(%arg0: i32, %arg1: i32) -> (i32, i32, i32) {
    %c0_i32 = arith.constant 0 : i32
    %c0_i32_0 = arith.constant 0 : i32
    %c0_i32_1 = arith.constant 0 : i32
    %c0_i32_2 = arith.constant 0 : i32
    return %c0_i32, %c0_i32_0, %c0_i32_1 : i32, i32, i32
  }
  func.func @transform_5(%arg0: i32, %arg1: i32) -> (i32, i32, i32) {
    %c0_i32 = arith.constant 0 : i32
    %c0_i32_0 = arith.constant 0 : i32
    %c0_i32_1 = arith.constant 0 : i32
    %c0_i32_2 = arith.constant 0 : i32
    return %c0_i32, %c0_i32_0, %c0_i32_1 : i32, i32, i32
  }
  func.func @transform_6(%arg0: i32, %arg1: i32) -> (i32, i32, i32) {
    %c0_i32 = arith.constant 0 : i32
    %c0_i32_0 = arith.constant 0 : i32
    %c0_i32_1 = arith.constant 0 : i32
    %c0_i32_2 = arith.constant 0 : i32
    return %c0_i32, %c0_i32_0, %c0_i32_1 : i32, i32, i32
  }
  func.func @transform_7(%arg0: i32, %arg1: i32) -> (i32, i32) {
    %c0_i32 = arith.constant 0 : i32
    %c0_i32_0 = arith.constant 0 : i32
    %c0_i32_1 = arith.constant 0 : i32
    return %c0_i32, %c0_i32_0 : i32, i32
  }
  func.func @transform_8(%arg0: i32, %arg1: i32) -> (i32, i32) {
    %c0_i32 = arith.constant 0 : i32
    %c0_i32_0 = arith.constant 0 : i32
    %c0_i32_1 = arith.constant 0 : i32
    return %c0_i32, %c0_i32_0 : i32, i32
  }
  func.func @transform_9(%arg0: i32, %arg1: i32) -> (i32, i32) {
    %c0_i32 = arith.constant 0 : i32
    %c0_i32_0 = arith.constant 0 : i32
    %c0_i32_1 = arith.constant 0 : i32
    return %c0_i32, %c0_i32_0 : i32, i32
  }
  func.func @transform_10(%arg0: i32, %arg1: i32) -> (i32, i32) {
    %c0_i32 = arith.constant 0 : i32
    %c0_i32_0 = arith.constant 0 : i32
    %c0_i32_1 = arith.constant 0 : i32
    return %c0_i32, %c0_i32_0 : i32, i32
  }
  func.func @transform_11(%arg0: i32, %arg1: i32) -> (i32, i32) {
    %c0_i32 = arith.constant 0 : i32
    %c0_i32_0 = arith.constant 0 : i32
    %c0_i32_1 = arith.constant 0 : i32
    return %c0_i32, %c0_i32_0 : i32, i32
  }
  func.func @transform_12(%arg0: i32, %arg1: i32) -> (i32, i32) {
    %c0_i32 = arith.constant 0 : i32
    %c0_i32_0 = arith.constant 0 : i32
    %c0_i32_1 = arith.constant 0 : i32
    return %c0_i32, %c0_i32_0 : i32, i32
  }
  func.func @transform_13(%arg0: i32, %arg1: i32) -> (i32, i32) {
    %c0_i32 = arith.constant 0 : i32
    %c0_i32_0 = arith.constant 0 : i32
    %c0_i32_1 = arith.constant 0 : i32
    return %c0_i32, %c0_i32_0 : i32, i32
  }
  func.func @transform_14(%arg0: i32, %arg1: i32) -> (i32, i32) {
    %c0_i32 = arith.constant 0 : i32
    %c0_i32_0 = arith.constant 0 : i32
    %c0_i32_1 = arith.constant 0 : i32
    return %c0_i32, %c0_i32_0 : i32, i32
  }
  func.func @transform_15(%arg0: i32, %arg1: i32) -> (i32, i32) {
    %c0_i32 = arith.constant 0 : i32
    %c0_i32_0 = arith.constant 0 : i32
    %c0_i32_1 = arith.constant 0 : i32
    return %c0_i32, %c0_i32_0 : i32, i32
  }
  func.func @transform_16(%arg0: i32, %arg1: i32) -> (i32, i32, i32) {
    %c0_i32 = arith.constant 0 : i32
    %c0_i32_0 = arith.constant 0 : i32
    return %arg0, %arg1, %c0_i32 : i32, i32, i32
  }
}

</mosaic_0001>

<bundles_post_ra>
// kernel: tpu_custom_call.1
= control target key start
LH: loop header
LB: loop body
LE: loop exit
PB: predicated region body
PF: predicated region fallthrough
CT: control target
= control target key end

     0   :  { %6 = vsyncpa [#allocation3], 0  ;;  %s103_s0 = inlined_call_operand.hbm [shape: f32[8,128], index: 0, kind: input, shape index: {}]   ;;  %s104_s1 = inlined_call_operand.hbm [shape: f32[8,128], index: 1, kind: output, shape index: {}]  }
   0x1   :  { %7 = vsyncpa [#allocation4], 0  ;;  %s85_s6 = smov [#allocation2]  }
   0x2   :  { %s14_s7 = sshll.u32 %s85_s6, 4  ;;  %s15_s7 = int_to_ptr.vmem [resolvable:$true] %s14_s7 }
   0x3   :  { %s49_s8 = scalar_lea.vmem %s15_s7, 128  ;;  %p54_p1 = scmp.lt.s32.totalorder %s15_s7, %s15_s7 }
   0x4   :  { %p50_p0 = scmp.ne.s32.totalorder %s15_s7, %s49_s8  ;;  %p55_p2 = scmp.lt.s32.totalorder %s49_s8, %s49_s8 }
   0x6   :  { %p56_p3 = por %p55_p2, %p54_p1 }
   0x8   :  { %p57_p4 = pnand %p56_p3, %p50_p0 }
   0xa   :  { %60 = shalt.err (!%p57_p4)
}
   0xb   :  { %17 = dma.hbm_to_vmem [thread:$0]  %s103_s0, 128, %s15_s7, [#allocation3]  }
   0xc   :  { %81 = dma.done.wait [#allocation3], 128  }
   0xd   :  { %82 = vsyncadd [#allocation3], 4294967168  ;;  %s86_s11 = smov [#allocation5]   ;;  %v21_v0 = vld [vmem:[#allocation2] sm:$0xff] }
   0xe   :  { %s30_s12 = sshll.u32 %s86_s11, 4  ;;  %v22_v1 = vadd.f32 1.0, %v21_v0  ;;  %s31_s12 = int_to_ptr.vmem [resolvable:$true] %s30_s12 }
   0xf   :  { %s61_s13 = scalar_lea.vmem %s31_s12, 128  ;;  %p66_p6 = scmp.lt.s32.totalorder %s31_s12, %s31_s12 }
  0x10   :  { %23 = vst [vmem:[#allocation5] sm:$0xff] %v22_v1  ;;  %p62_p5 = scmp.ne.s32.totalorder %s31_s12, %s61_s13  ;;  %p67_p7 = scmp.lt.s32.totalorder %s61_s13, %s61_s13 }
  0x12   :  { %p68_p8 = por %p67_p7, %p66_p6 }
  0x14   :  { %p69_p9 = pnand %p68_p8, %p62_p5 }
  0x16   :  { %72 = shalt.err (!%p69_p9)
}
  0x17   :  { %33 = dma.vmem_to_hbm [thread:$0]  %s31_s12, 128, %s104_s1, [#allocation4]  }
  0x18   :  { %83 = dma.done.wait [#allocation4], 128  }
  0x19   :  { %84 = vsyncadd [#allocation4], 4294967168 }
  0x1a   :  { %37 = vsyncpa [#allocation3], 1 }
  0x1b   :  { %38 = vsyncpa [#allocation4], 1 }

// kernel: tpu_custom_call.1
= control target key start
LH: loop header
LB: loop body
LE: loop exit
PB: predicated region body
PF: predicated region fallthrough
CT: control target
= control target key end

     0   :  { %s3347_s0 = inlined_call_operand.vmem [shape: bf16[2,8,32], index: 0, kind: input, shape index: {}]   ;;  %s3348_s1 = inlined_call_operand.vmem [shape: bf16[2,8,32], index: 1, kind: input, shape index: {}]   ;;  %s3349_s2 = inlined_call_operand.vmem [shape: bf16[4,32,8], index: 2, kind: input, shape index: {}]   ;;  %s3350_s3 = inlined_call_operand.vmem [shape: f32[4,1,8], index: 3, kind: input, shape index: {}]   ;;  %s3351_s4 = inlined_call_operand.vmem [shape: bf16[8,32,8], index: 4, kind: input, shape index: {}]   ;;  %s3352_s5 = inlined_call_operand.vmem [shape: f32[8,1,8], index: 5, kind: input, shape index: {}]   ;;  %s3353_s6 = inlined_call_operand.vmem [shape: bf16[4,8,32], index: 6, kind: input, shape index: {}]   ;;  %s3354_s7 = inlined_call_operand.vmem [shape: f32[1,32], index: 7, kind: input, shape index: {}]   ;;  %s3355_s8 = inlined_call_operand.vmem [shape: f32[1,32], index: 8, kind: input, shape index: {}]   ;;  %s3356_s9 = inlined_call_operand.vmem [shape: f32[1,32], index: 9, kind: input, shape index: {}]   ;;  %s3357_s10 = inlined_call_operand.vmem [shape: bf16[32,64], index: 10, kind: input, shape index: {}]   ;;  %s3358_s11 = inlined_call_operand.vmem [shape: f32[1,64], index: 11, kind: input, shape index: {}]   ;;  %s3359_s12 = inlined_call_operand.vmem [shape: bf16[64,32], index: 12, kind: input, shape index: {}]   ;;  %s3360_s13 = inlined_call_operand.vmem [shape: f32[1,32], index: 13, kind: input, shape index: {}]   ;;  %s3361_s14 = inlined_call_operand.vmem [shape: f32[1,32], index: 14, kind: input, shape index: {}]   ;;  %s3362_s15 = inlined_call_operand.vmem [shape: f32[1,32], index: 15, kind: input, shape index: {}]   ;;  %s3363_s16 = inlined_call_operand.hbm [shape: bf16[2,8,32], index: 16, kind: output, shape index: {}]  }
   0x1   :  { %3368 = sst [smem:[#allocation10_spill]] %s3347_s0 }
   0x2   :  { %3369 = sst [smem:[#allocation11_spill]] %s3348_s1 }
   0x3   :  { %3370 = sst [smem:[#allocation12_spill]] %s3349_s2 }
   0x4   :  { %21 = vsyncpa [#allocation3], 0 }
   0x5   :  { %23 = vsyncpa [#allocation3 + $0x1], 0  ;;  %s2929_s21 = smov 0   ;;  %s2931_s22 = smov 0  }
   0x6   :  { %s2933_s23 = smov 0   ;;  %s2935_s24 = smov 0  }
   0x7   :  { %s2937_s25 = smov 0   ;;  %s2939_s26 = smov 0  }
   0x8 LB: > { %3371 = sst [smem:[#allocation5_spill]] %s2827_s23  ;;  %s2305_s27 = sadd.s32 4294967295, %s2839_s26   ;;  %s2839_s26 = sphi %s2939_s26, %s29_s26   ;;  %s2835_s25 = sphi %s2937_s25, %s3385_s25   ;;  %s2831_s24 = sphi %s2935_s24, %s3388_s24   ;;  %s2827_s23 = sphi %s2933_s23, %s3383_s23   ;;  %s2823_s22 = sphi %s2931_s22, %s3387_s22   ;;  %s2819_s21 = sphi %s2929_s21, %s3386_s21  }
   0x9   : > { %3372 = sst [smem:[#allocation6_spill]] %s2835_s25  ;;  %s2306_s28 = sadd.s32 4294967294, %s2839_s26  }
   0xa   : > { %s41_s29 = sadd.s32 1, %s2835_s25  ;;  %s398_s30 = sadd.s32 1, %s2827_s23 }
   0xb   : > { %p43_p0 = scmp.ge.s32.totalorder %s41_s29, 2  ;;  %p408_p1 = scmp.ne.s32.totalorder %s2827_s23, %s2823_s22 }
   0xc   : > { %p409_p2 = scmp.eq.s32.totalorder %s2305_s27, 1  ;;  %p414_p3 = scmp.ne.s32.totalorder %s2823_s22, %s2819_s21 }
   0xd   : > { %s3390_s29 = smov (%p43_p0, %s41_s29), 0  ;;  %p415_p5 = scmp.eq.s32.totalorder %s2306_s28, 1 }
   0xe   : > { %3373 = sst [smem:[#allocation7_spill]] %s3390_s29  ;;  %p2969_p4 = por %p409_p2, %p408_p1 }
   0xf   : > { %s393_s17 = ssub.s32 %s2835_s25, %s3390_s29  ;;  %p2309_p6 = scmp.ge.s32.totalorder %s2839_s26, 1 }
  0x10   : > { %p396_p7 = scmp.eq.s32.totalorder %s393_s17, 0  ;;  %p2976_p8 = por %p415_p5, %p414_p3 }
  0x11   : > { %p492_p9 = scmp.lt.s32.totalorder %s2839_s26, 3 }
  0x12   : > { %s3375_s18 = scalar_select %p2976_p8, 1, 0 }
  0x13   : > { %s2982_s19 = scalar_select %p396_p7, %s2827_s23, %s398_s30  }
  0x14   : > { %3376 = sst [smem:[#allocation8_spill]] %s3375_s18  ;;  %p493_p10 = pnand %p2309_p6, %p492_p9 }
  0x15   : > { %3377 = sst [smem:[#allocation9_spill]] %s2982_s19  ;;  %p548_p11 = scmp.lt.s32.totalorder (!%p493_p10), %s2831_s24, 1 }
  0x16   : > { %496 = sbr.rel (%p493_p10) target bundleno = 2049 (0x801), region = 84  ;;  %s3378_s2 = sld [smem:[#allocation12_spill]] (!%p493_p10) }
  0x17   : > { %s3379_s20 = sld [smem:[#allocation10_spill]] (!%p493_p10)  ;;  %s545_s19 = sand.u32 (!%p493_p10), 1, %s2823_s22  }
  0x18   : > { %s3380_s1 = sld [smem:[#allocation11_spill]] (!%p493_p10)  ;;  %s2310_s17 = sshll.u32 (!%p493_p10), %s545_s19, 2 }
  0x19   : > { %s547_s25 = scalar_lea.vmem (!%p493_p10), [#allocation2], %s2310_s17 }
  0x1a   : > { %s2222_s23 = sshll.u32 (!%p493_p10), %s547_s25, 4  ;;  %s2223_s23 = int_to_ptr.vmem [resolvable:$true] %s2222_s23 }
  0x1b   : > { %v2841_v1 = vmov 0.0   ;;  %vm2842_vm0 = vmmov 0   ;;  %s3006_s28 = scalar_select %p548_p11, %s2831_s24, 1  ;;  %vm618_vm1 = vcmask 261120   ;;  %v2713_v10 = vld [vmem:[%s3351_s4 + $0x8] sm:$0xff]   ;;  %v2714_v11 = vld [vmem:[%s3351_s4 + $0x18] sm:$0xff]  }
  0x1c   : > { %v2705_v0 = vld [vmem:[%s3378_s2 + $0x8] sm:$0xff]   ;;  %2460 = vmatprep.subr.bf16.mxu0 %v2841_v1  ;;  %2468 = vmatprep.subr.bf16.mxu1 %v2841_v1  ;;  %v2706_v2 = vld [vmem:[%s3378_s2 + $0x18] sm:$0xff]   ;;  %v2707_v3 = vld [vmem:[%s3378_s2] sm:$0xff]   ;;  %vm1341_vm2 = vcmask 64512   ;;  %vm1589_vm3 = vcmask 1043456   ;;  %vm2130_vm4 = vcmask 523264  }
  0x1d   : > { %2461 = vmatpush3.bf16.msra.mxu0 %v2705_v0  ;;  %2464 = vmatprep.mubr.msk.bf16.mxu0 %vm2842_vm0, %v2841_v1  ;;  %v2708_v4 = vld [vmem:[%s3378_s2 + $0x10] sm:$0xff]   ;;  %s2311_s29 = sshll.u32 %s3006_s28, 2  ;;  %v2709_v5 = vld [vmem:[%s3378_s2 + $0x28] sm:$0xff]   ;;  %v2710_v6 = vld [vmem:[%s3378_s2 + $0x38] sm:$0xff]   ;;  %s2389_s28 = sshll.u32 %s2831_s24, 6  ;;  %vm2205_vm5 = vcmask 257024  }
  0x1e   : > { %2469 = vmatpush3.bf16.msra.mxu1 %v2706_v2  ;;  %2462 = vmatprep.subr.bf16.mxu0 %v2841_v1  ;;  %s554_s27 = scalar_lea.vmem %s3379_s20, %s2311_s29  ;;  %v2711_v8 = vld [vmem:[%s3378_s2 + $0x20] sm:$0xff]   ;;  %v2712_v9 = vld [vmem:[%s3378_s2 + $0x30] sm:$0xff]   ;;  %s558_s18 = scalar_lea.vmem %s3380_s1, %s2311_s29  ;;  %v2717_v15 = vld [vmem:[%s3351_s4 + $0x28] sm:$0xff]  }
  0x1f   : > { %2470 = vmatprep.subr.bf16.mxu1 %v2841_v1  ;;  %2472 = vmatprep.mubr.msk.bf16.mxu1 %vm2842_vm0, %v2841_v1  ;;  %v3019_v7 = vld [vmem:[%s554_s27] sm:$0xf]  ;;  %v2716_v13 = vld [vmem:[%s3351_s4 + $0x10] sm:$0xff]   ;;  %v2718_v16 = vld [vmem:[%s3351_s4 + $0x38] sm:$0xff]   ;;  %s2220_s2 = scalar_lea.hbm %s3363_s16, %s2389_s28  ;;  %s2208_s29 = scalar_lea.sflag [#allocation3], %s545_s19 }
  0x20   : > { %v2715_v12 = vld [vmem:[%s3351_s4] sm:$0xff]   ;;  %v2720_v18 = vld [vmem:[%s3351_s4 + $0x30] sm:$0xff]   ;;  %v2721_v19 = vld [vmem:[%s3351_s4 + $0x48] sm:$0xff]   ;;  %s2763_s30 = scalar_lea.vmem %s2223_s23, 64  ;;  %s2843_s20 = smov [#allocation2]  }
  0x21   : > { %2463 = vmatpush3.bf16.msra.mxu0 %v2707_v3  ;;  %v561_v14 = vld [vmem:[%s558_s18] sm:$0xf]  ;;  %v2723_v21 = vld [vmem:[%s3351_s4 + $0x58] sm:$0xff]   ;;  %v2724_v22 = vld [vmem:[%s3351_s4 + $0x50] sm:$0xff]   ;;  %p2764_p12 = scmp.ne.s32.totalorder %s2223_s23, %s2763_s30  ;;  %s2767_s27 = sshll.u32 %s2843_s20, 4  ;;  %s2768_s27 = int_to_ptr.vmem [resolvable:$false] %s2767_s27 }
  0x22   : > { %2471 = vmatpush3.bf16.msra.mxu1 %v2708_v4  ;;  %2476 = vmatprep.subr.bf16.mxu0 %v2841_v1  ;;  %v2719_v17 = vld [vmem:[%s3351_s4 + $0x20] sm:$0xff]   ;;  %v2725_v23 = vld [vmem:[%s3351_s4 + $0x68] sm:$0xff]   ;;  %v2727_v25 = vld [vmem:[%s3351_s4 + $0x78] sm:$0xff]   ;;  %s2769_s24 = scalar_lea.vmem %s2768_s27, 128  ;;  %p2770_p1 = scmp.lt.s32.totalorder %s2223_s23, %s2768_s27 }
  0x23   : > { %2484 = vmatprep.subr.bf16.mxu1 %v2841_v1  ;;  %v2722_v20 = vld [vmem:[%s3351_s4 + $0x40] sm:$0xff]   ;;  %v2728_v26 = vld [vmem:[%s3351_s4 + $0x70] sm:$0xff]   ;;  %p2765_p13 = pnand %p2764_p12, %p2969_p4  ;;  %p2771_p2 = scmp.lt.s32.totalorder %s2769_s24, %s2763_s30 }
  0x24   : > { %2465 = vmatmul.mubr.msk.bf16.vlgmr.msra.gmra.mxu0 %vm618_vm1, %v3019_v7  ;;  %v2726_v24 = vld [vmem:[%s3351_s4 + $0x60] sm:$0xff]  }
  0x25   : > { %2473 = vmatmul.mubr.msk.bf16.vlgmr.msra.gmra.mxu1 %vm618_vm1, %v3019_v7  ;;  %2477 = vmatpush3.bf16.msra.mxu0 %v2709_v5  ;;  %v2329_v42 = vld [vmem:[%s3352_s5] ss:$0 sm:$0xff]  ;;  %v2330_v44 = vld [vmem:[%s3352_s5 + $0x1] ss:$0 sm:$0xff]  ;;  %v2331_v62 = vld [vmem:[%s3352_s5 + $0x2] ss:$0 sm:$0xff]  ;;  %p2766_p0 = pneg %p2765_p13  ;;  %p2772_p3 = por %p2771_p2, %p2770_p1 }
  0x26   : > { %2485 = vmatpush3.bf16.msra.mxu1 %v2710_v6  ;;  %2478 = vmatprep.subr.bf16.mxu0 %v2841_v1  ;;  %v2313_v45 = vld [vmem:[%s3350_s3] ss:$0 sm:$0xff]  ;;  %v2314_v47 = vld [vmem:[%s3350_s3 + $0x1] ss:$0 sm:$0xff]  ;;  %v2332_v2 = vld [vmem:[%s3352_s5 + $0x3] ss:$0 sm:$0xff] }
  0x27   : > { %2486 = vmatprep.subr.bf16.mxu1 %v2841_v1  ;;  %2480 = vmatprep.mubr.msk.bf16.mxu0 %vm2842_vm0, %v2841_v1  ;;  %v2315_v4 = vld [vmem:[%s3350_s3 + $0x2] ss:$0 sm:$0xff]  ;;  %v2316_v6 = vld [vmem:[%s3350_s3 + $0x3] ss:$0 sm:$0xff]  ;;  %p2773_p5 = pnand %p2772_p3, %p2766_p0 }
  0x28   : > { %2488 = vmatprep.mubr.msk.bf16.mxu1 %vm2842_vm0, %v2841_v1 }
  0x29   : > { %2479 = vmatpush3.bf16.msra.mxu0 %v2711_v8 }
  0x2a   : > { %2487 = vmatpush3.bf16.msra.mxu1 %v2712_v9  ;;  %2492 = vmatprep.subr.bf16.mxu0 %v2841_v1 }
  0x2b   : > { %2500 = vmatprep.subr.bf16.mxu1 %v2841_v1 }
  0x2c   : > { %2481 = vmatmul.mubr.msk.bf16.vlgmr.msra.gmra.mxu0 %vm618_vm1, %v3019_v7 }
  0x2d   : > { %2489 = vmatmul.mubr.msk.bf16.vlgmr.msra.gmra.mxu1 %vm618_vm1, %v3019_v7  ;;  %2493 = vmatpush3.bf16.msra.mxu0 %v2713_v10 }
  0x2e   : > { %2501 = vmatpush3.bf16.msra.mxu1 %v2714_v11  ;;  %2494 = vmatprep.subr.bf16.mxu0 %v2841_v1 }
  0x2f   : > { %2502 = vmatprep.subr.bf16.mxu1 %v2841_v1  ;;  %2496 = vmatprep.mubr.msk.bf16.mxu0 %vm2842_vm0, %v2841_v1 }
  0x30   : > { %2504 = vmatprep.mubr.msk.bf16.mxu1 %vm2842_vm0, %v2841_v1 }
  0x31   : > { %2495 = vmatpush3.bf16.msra.mxu0 %v2715_v12 }
  0x32   : > { %2503 = vmatpush3.bf16.msra.mxu1 %v2716_v13  ;;  %2508 = vmatprep.subr.bf16.mxu0 %v2841_v1 }
  0x33   : > { %2516 = vmatprep.subr.bf16.mxu1 %v2841_v1 }
  0x34   : > { %2497 = vmatmul.mubr.msk.bf16.vlgmr.msra.gmra.mxu0 %vm618_vm1, %v561_v14 }
  0x35   : > { %2505 = vmatmul.mubr.msk.bf16.vlgmr.msra.gmra.mxu1 %vm618_vm1, %v561_v14  ;;  %2509 = vmatpush3.bf16.msra.mxu0 %v2717_v15 }
  0x36   : > { %2517 = vmatpush3.bf16.msra.mxu1 %v2718_v16  ;;  %2510 = vmatprep.subr.bf16.mxu0 %v2841_v1 }
  0x37   : > { %2518 = vmatprep.subr.bf16.mxu1 %v2841_v1  ;;  %2512 = vmatprep.mubr.msk.bf16.mxu0 %vm2842_vm0, %v2841_v1 }
  0x38   : > { %2520 = vmatprep.mubr.msk.bf16.mxu1 %vm2842_vm0, %v2841_v1 }
  0x39   : > { %2511 = vmatpush3.bf16.msra.mxu0 %v2719_v17 }
  0x3a   : > { %2519 = vmatpush3.bf16.msra.mxu1 %v2720_v18  ;;  %2524 = vmatprep.subr.bf16.mxu0 %v2841_v1 }
  0x3b   : > { %2532 = vmatprep.subr.bf16.mxu1 %v2841_v1 }
  0x3c   : > { %2513 = vmatmul.mubr.msk.bf16.vlgmr.msra.gmra.mxu0 %vm618_vm1, %v561_v14 }
  0x3d   : > { %2521 = vmatmul.mubr.msk.bf16.vlgmr.msra.gmra.mxu1 %vm618_vm1, %v561_v14  ;;  %2528 = vmatprep.mubr.msk.bf16.mxu0 %vm2842_vm0, %v2841_v1 }
  0x3e   : > { %2536 = vmatprep.mubr.msk.bf16.mxu1 %vm2842_vm0, %v2841_v1  ;;  %2525 = vmatpush3.bf16.msra.mxu0 %v2721_v19 }
  0x3f   : > { %2526 = vmatprep.subr.bf16.mxu0 %v2841_v1  ;;  %2533 = vmatpush3.bf16.msra.mxu1 %v2723_v21 }
  0x40   : > { %2534 = vmatprep.subr.bf16.mxu1 %v2841_v1 }
  0x42   : > { %2527 = vmatpush3.bf16.msra.mxu0 %v2722_v20 }
  0x43   : > { %2540 = vmatprep.subr.bf16.mxu0 %v2841_v1  ;;  %2535 = vmatpush3.bf16.msra.mxu1 %v2724_v22 }
  0x44   : > { %2548 = vmatprep.subr.bf16.mxu1 %v2841_v1 }
  0x45   : > { %2529 = vmatmul.mubr.msk.bf16.vlgmr.msra.gmra.mxu0 %vm618_vm1, %v561_v14 }
  0x46   : > { %2541 = vmatpush3.bf16.msra.mxu0 %v2725_v23  ;;  %2544 = vmatprep.mubr.msk.bf16.mxu0 %vm2842_vm0, %v2841_v1 }
  0x47   : > { %2542 = vmatprep.subr.bf16.mxu0 %v2841_v1  ;;  %2537 = vmatmul.mubr.msk.bf16.vlgmr.msra.gmra.mxu1 %vm618_vm1, %v561_v14 }
  0x48   : > { %2549 = vmatpush3.bf16.msra.mxu1 %v2727_v25  ;;  %2552 = vmatprep.mubr.msk.bf16.mxu1 %vm2842_vm0, %v2841_v1 }
  0x49   : > { %2550 = vmatprep.subr.bf16.mxu1 %v2841_v1 }
  0x4a   : > { %2543 = vmatpush3.bf16.msra.mxu0 %v2726_v24 }
  0x4b   : > { %2556 = vmatprep.subr.bf16.mxu0 %v2841_v1 }
  0x4c   : > { %2551 = vmatpush3.bf16.msra.mxu1 %v2728_v26 }
  0x4d   : > { %2545 = vmatmul.mubr.msk.bf16.vlgmr.msra.gmra.mxu0 %vm618_vm1, %v561_v14  ;;  %2562 = vmatprep.subr.bf16.mxu1 %v2841_v1 }
  0x4e   : > { %2558 = vmatprep.mubr.msk.bf16.mxu0 %vm2842_vm0, %v2841_v1 }
  0x4f   : > { %2553 = vmatmul.mubr.msk.bf16.vlgmr.msra.gmra.mxu1 %vm618_vm1, %v561_v14 }
  0x50   : > { %2564 = vmatprep.mubr.msk.bf16.mxu1 %vm2842_vm0, %v2841_v1 }
  0xe4   : > { %v656_v27 = vpop.f32.mrf.mxu0 }
  0xe5   : > { %v708_v28 = vpop.f32.mrf.mxu1  ;;  %v657_v52 = vadd.f32 %v2313_v45, %v656_v27 }
  0xe6   : > { %v2466_v29 = vpop.f32.mrf.mxu0  ;;  %v709_v55 = vadd.f32 %v2314_v47, %v708_v28 }
  0xe7   : > { %v2474_v30 = vpop.f32.mrf.mxu1  ;;  %v818_v63 = vmul.f32 0.35355338, %v657_v52  ;;  %v2333_v29 = vld [vmem:[%s3352_s5 + $0x4] ss:$0 sm:$0xff] }
  0xe8   : > { %v659_v31 = vpop.f32.mrf.mxu0  ;;  %v819_v3 = vmul.f32 0.35355338, %v709_v55 }
  0xe9   : > { %v711_v32 = vpop.f32.mrf.mxu1  ;;  %v822_v12 = vpack.c.bf16 %v818_v63, %v818_v63 }
  0xea   : > { %v2467_v33 = vpop.f32.mrf.mxu0  ;;  %v823_v16 = vpack.c.bf16 %v819_v3, %v819_v3 }
  0xeb   : > { %v2475_v34 = vpop.f32.mrf.mxu1  ;;  %v2334_v33 = vld [vmem:[%s3352_s5 + $0x5] ss:$0 sm:$0xff] }
  0xec   : > { %v760_v35 = vpop.f32.mrf.mxu0 }
  0xed   : > { %v812_v36 = vpop.f32.mrf.mxu1  ;;  %v761_v13 = vadd.f32 %v2315_v4, %v760_v35 }
  0xee   : > { %v2482_v37 = vpop.f32.mrf.mxu0  ;;  %v813_v17 = vadd.f32 %v2316_v6, %v812_v36 }
  0xef   : > { %v2490_v38 = vpop.f32.mrf.mxu1  ;;  %v820_v24 = vmul.f32 0.35355338, %v761_v13 }
  0xf0   : > { %v763_v39 = vpop.f32.mrf.mxu0  ;;  %v821_v26 = vmul.f32 0.35355338, %v813_v17 }
  0xf1   : > { %v815_v40 = vpop.f32.mrf.mxu1  ;;  %v824_v27 = vpack.c.bf16 %v820_v24, %v820_v24  ;;  %v2336_v24 = vld [vmem:[%s3352_s5 + $0x7] ss:$0 sm:$0xff] }
  0xf2   : > { %v2483_v41 = vpop.f32.mrf.mxu0  ;;  %v825_v28 = vpack.c.bf16 %v821_v26, %v821_v26 }
  0xf3   : > { %v2491_v43 = vpop.f32.mrf.mxu1 }
  0xf4   : > { %v963_v46 = vpop.f32.mrf.mxu0 }
  0xf5   : > { %v964_v48 = vadd.f32 %v2329_v42, %v963_v46  ;;  %v1015_v49 = vpop.f32.mrf.mxu1 }
  0xf6   : > { %v1016_v50 = vadd.f32 %v2330_v44, %v1015_v49  ;;  %v2498_v51 = vpop.f32.mrf.mxu0 }
  0xf7   : > { %v1333_v53 = vpack.c.bf16 %v964_v48, %v964_v48  ;;  %v2506_v54 = vpop.f32.mrf.mxu1 }
  0xf8   : > { %v1334_v56 = vpack.c.bf16 %v1016_v50, %v1016_v50  ;;  %v966_v57 = vpop.f32.mrf.mxu0 }
  0xf9   : > { %v1346_v58 = vsel %vm1341_vm2, %v1333_v53, 0  ;;  %v1018_v59 = vpop.f32.mrf.mxu1 }
  0xfa   : > { %v1392_v60 = vsel %vm1341_vm2, %v1334_v56, 0  ;;  %v2499_v61 = vpop.f32.mrf.mxu0  ;;  %2557 = vmatpush3.bf16.xpose.msra.mxu0 %v1346_v58 }
  0xfb   : > { %v2507_v0 = vpop.f32.mrf.mxu1  ;;  %2563 = vmatpush3.bf16.xpose.msra.mxu1 %v1392_v60  ;;  %2568 = vmatprep.subr.bf16.mxu0 %v2841_v1 }
  0xfc   : > { %v1067_v5 = vpop.f32.mrf.mxu0  ;;  %2574 = vmatprep.subr.bf16.mxu1 %v2841_v1 }
  0xfd   : > { %v1068_v8 = vadd.f32 %v2331_v62, %v1067_v5  ;;  %v1119_v9 = vpop.f32.mrf.mxu1 }
  0xfe   : > { %v1120_v10 = vadd.f32 %v2332_v2, %v1119_v9  ;;  %v2514_v11 = vpop.f32.mrf.mxu0 }
  0xff   : > { %v1335_v14 = vpack.c.bf16 %v1068_v8, %v1068_v8  ;;  %v2522_v15 = vpop.f32.mrf.mxu1 }
 0x100   : > { %v1336_v18 = vpack.c.bf16 %v1120_v10, %v1120_v10  ;;  %v1070_v19 = vpop.f32.mrf.mxu0 }
 0x101   : > { %v1438_v20 = vsel %vm1341_vm2, %v1335_v14, 0  ;;  %v1122_v21 = vpop.f32.mrf.mxu1  ;;  %2559 = vmatmul.mubr.msk.bf16.vlgmr.msra.gmra.mxu0 %vm1341_vm2, %v822_v12  ;;  %v2335_v19 = vld [vmem:[%s3352_s5 + $0x6] ss:$0 sm:$0xff] }
 0x102   : > { %v1484_v22 = vsel %vm1341_vm2, %v1336_v18, 0  ;;  %2565 = vmatmul.mubr.msk.bf16.vlgmr.msra.gmra.mxu1 %vm1341_vm2, %v823_v16  ;;  %v2515_v23 = vpop.f32.mrf.mxu0  ;;  %2569 = vmatpush3.bf16.xpose.msra.mxu0 %v1438_v20 }
 0x103   : > { %v2523_v25 = vpop.f32.mrf.mxu1  ;;  %2575 = vmatpush3.bf16.xpose.msra.mxu1 %v1484_v22  ;;  %2570 = vmatprep.mubr.msk.bf16.mxu0 %vm2842_vm0, %v2841_v1 }
 0x104   : > { %2576 = vmatprep.mubr.msk.bf16.mxu1 %vm2842_vm0, %v2841_v1  ;;  %2580 = vmatprep.subr.bf16.mxu0 %v2841_v1 }
 0x105   : > { %2586 = vmatprep.subr.bf16.mxu1 %v2841_v1  ;;  %v1171_v30 = vpop.f32.mrf.mxu0 }
 0x106   : > { %v1172_v31 = vadd.f32 %v2333_v29, %v1171_v30 }
 0x107   : > { %v2530_v32 = vpop.f32.mrf.mxu0  ;;  %v1223_v36 = vpop.f32.mrf.mxu1 }
 0x108   : > { %v1337_v34 = vpack.c.bf16 %v1172_v31, %v1172_v31  ;;  %v1224_v38 = vadd.f32 %v2334_v33, %v1223_v36 }
 0x109   : > { %2571 = vmatmul.mubr.msk.bf16.vlgmr.msra.gmra.mxu0 %vm1341_vm2, %v824_v27  ;;  %v1174_v35 = vpop.f32.mrf.mxu0  ;;  %v2538_v40 = vpop.f32.mrf.mxu1 }
 0x10a   : > { %2577 = vmatmul.mubr.msk.bf16.vlgmr.msra.gmra.mxu1 %vm1341_vm2, %v825_v28  ;;  %2582 = vmatprep.mubr.msk.bf16.mxu0 %vm2842_vm0, %v2841_v1  ;;  %v1591_v37 = vsel %vm1589_vm3, %v1337_v34, 0  ;;  %v1338_v41 = vpack.c.bf16 %v1224_v38, %v1224_v38 }
 0x10b   : > { %2588 = vmatprep.mubr.msk.bf16.mxu1 %vm2842_vm0, %v2841_v1  ;;  %v2531_v39 = vpop.f32.mrf.mxu0  ;;  %2581 = vmatpush3.bf16.msra.mxu0 %v1591_v37  ;;  %v1226_v42 = vpop.f32.mrf.mxu1 }
 0x10c   : > { %2592 = vmatprep.subr.bf16.mxu0 %v2841_v1  ;;  %v1637_v44 = vsel %vm1589_vm3, %v1338_v41, 0 }
 0x10d   : > { %v1275_v43 = vpop.f32.mrf.mxu0  ;;  %v2539_v45 = vpop.f32.mrf.mxu1  ;;  %2587 = vmatpush3.bf16.msra.mxu1 %v1637_v44 }
 0x10e   : > { %2598 = vmatprep.subr.bf16.mxu1 %v2841_v1  ;;  %v1276_v23 = vadd.f32 %v2335_v19, %v1275_v43  ;;  %v1787_v43 = vld [vmem:[%s3353_s6] sm:$0xf]  ;;  %v1788_v45 = vld [vmem:[%s3353_s6 + $0x4] sm:$0xf] }
 0x10f   : > { %v2546_v46 = vpop.f32.mrf.mxu0  ;;  %v1327_v48 = vpop.f32.mrf.mxu1  ;;  %v1795_v44 = vsel %vm1589_vm3, %v1787_v43, 0 }
 0x110   : > { %v1339_v26 = vpack.c.bf16 %v1276_v23, %v1276_v23  ;;  %v1328_v27 = vadd.f32 %v2336_v24, %v1327_v48  ;;  %v1841_v46 = vsel %vm1589_vm3, %v1788_v45, 0  ;;  %v1790_v23 = vld [vmem:[%s3353_s6 + $0xc] sm:$0xf] }
 0x111   : > { %v1278_v47 = vpop.f32.mrf.mxu0  ;;  %v2554_v50 = vpop.f32.mrf.mxu1 }
 0x112   : > { %v1683_v31 = vsel %vm1589_vm3, %v1339_v26, 0  ;;  %v1340_v32 = vpack.c.bf16 %v1328_v27, %v1328_v27 }
 0x113   : > { %v2547_v49 = vpop.f32.mrf.mxu0  ;;  %v1330_v51 = vpop.f32.mrf.mxu1 }
 0x114   : > { %v1729_v36 = vsel %vm1589_vm3, %v1340_v32, 0 }
 0x115   : > { %v2555_v52 = vpop.f32.mrf.mxu1 }
 0x1c1   : > { %v1382_v53 = vpop.f32.mrf.mxu0 }
 0x1c2   : > { %v1428_v54 = vpop.f32.mrf.mxu1  ;;  %v1526_v55 = vsel %vm1341_vm2, %v1382_v53, -inf }
 0x1c3   : > { %1527 = vmax.xlane.f32.xlu0 %v1526_v55  ;;  %v2560_v56 = vpop.f32.mrf.mxu0  ;;  %v1529_v60 = vsel %vm1341_vm2, %v1428_v54, -inf }
 0x1c4   : > { %v2566_v57 = vpop.f32.mrf.mxu1 }
 0x1c5   : > { %v1385_v58 = vpop.f32.mrf.mxu0 }
 0x1c6   : > { %v1431_v59 = vpop.f32.mrf.mxu1 }
 0x1c7   : > { %1530 = vmax.xlane.f32.xlu0 %v1529_v60  ;;  %v2561_v61 = vpop.f32.mrf.mxu0 }
 0x1c8   : > { %v2567_v62 = vpop.f32.mrf.mxu1 }
 0x1c9   : > { %v1474_v63 = vpop.f32.mrf.mxu0 }
 0x1ca   : > { %v1520_v0 = vpop.f32.mrf.mxu1  ;;  %v1532_v2 = vsel %vm1341_vm2, %v1474_v63, -inf }
 0x1cb   : > { %1533 = vmax.xlane.f32.xlu1 %v1532_v2  ;;  %v2572_v3 = vpop.f32.mrf.mxu0  ;;  %v1535_v8 = vsel %vm1341_vm2, %v1520_v0, -inf }
 0x1cc   : > { %v2578_v4 = vpop.f32.mrf.mxu1 }
 0x1cd   : > { %v1477_v5 = vpop.f32.mrf.mxu0 }
 0x1ce   : > { %v1523_v6 = vpop.f32.mrf.mxu1 }
 0x1cf   : > { %1536 = vmax.xlane.f32.xlu1 %v1535_v8  ;;  %v2573_v9 = vpop.f32.mrf.mxu0 }
 0x1d0   : > { %v2579_v10 = vpop.f32.mrf.mxu1 }
 0x24c   : > { %v1528_v11 = vpop.xlane.xlu0 %1527 }
 0x24d   : > { %v1550_v12 = vsub.f32 %v1382_v53, %v1528_v11  ;;  %v1538_v47 = vsub.f32 -inf, %v1528_v11 }
 0x24f   : > { %v1554_v13 = vmul.f32 1.442695, %v1550_v12  ;;  %v1542_v48 = vmul.f32 1.442695, %v1538_v47 }
 0x250   : > { %v1531_v14 = vpop.xlane.xlu0 %1530 }
 0x251   : > { %v1551_v15 = vsub.f32 %v1428_v54, %v1531_v14  ;;  %2735 = vpow2.f32 %v1554_v13  ;;  %v1539_v49 = vsub.f32 -inf, %v1531_v14  ;;  %v1789_v13 = vld [vmem:[%s3353_s6 + $0x8] sm:$0xf] }
 0x252   : > { %v1887_v19 = vsel %vm1589_vm3, %v1789_v13, 0 }
 0x253   : > { %v1556_v16 = vmul.f32 1.442695, %v1551_v15  ;;  %v1544_v50 = vmul.f32 1.442695, %v1539_v49 }
 0x254   : > { %v1534_v17 = vpop.xlane.xlu1 %1533 }
 0x255   : > { %v1552_v18 = vsub.f32 %v1474_v63, %v1534_v17  ;;  %2737 = vpow2.f32 %v1556_v16  ;;  %v1540_v51 = vsub.f32 -inf, %v1534_v17 }
 0x257   : > { %v1558_v20 = vmul.f32 1.442695, %v1552_v18  ;;  %v1546_v52 = vmul.f32 1.442695, %v1540_v51 }
 0x258   : > { %v1537_v21 = vpop.xlane.xlu1 %1536 }
 0x259   : > { %v1553_v22 = vsub.f32 %v1520_v0, %v1537_v21  ;;  %2739 = vpow2.f32 %v1558_v20  ;;  %v1541_v53 = vsub.f32 -inf, %v1537_v21 }
 0x25b   : > { %v1560_v25 = vmul.f32 1.442695, %v1553_v22  ;;  %v1548_v54 = vmul.f32 1.442695, %v1541_v53 }
 0x25d   : > { %2741 = vpow2.f32 %v1560_v25 }
 0x25e   : > { %v2736_v28 = vpop.eup %2735  ;;  %2743 = vpow2.f32 %v1542_v48 }
 0x25f   : > { %v1566_v29 = vsel %vm1341_vm2, %v2736_v28, 0.0  ;;  %v1582_v30 = vpack.c.bf16 %v2736_v28, %v2736_v28  ;;  %2745 = vpow2.f32 %v1544_v50 }
 0x260   : > { %1567 = vadd.xlane.f32.xlu0 %v1566_v29  ;;  %2747 = vpow2.f32 %v1546_v52  ;;  %v1933_v29 = vsel %vm1589_vm3, %v1790_v23, 0  ;;  %v2374_v23 = vld [vmem:[%s3355_s8] ss:$0 sm:$0xff] }
 0x261   : > { %2583 = vmatmul.mubr.msk.bf16.vlgmr.msra.gmra.mxu0 %vm1341_vm2, %v1582_v30  ;;  %2749 = vpow2.f32 %v1548_v54 }
 0x262   : > { %v2738_v33 = vpop.eup %2737  ;;  %2593 = vmatpush3.bf16.msra.mxu0 %v1683_v31  ;;  %2594 = vmatprep.mubr.msk.bf16.mxu0 %vm2842_vm0, %v2841_v1 }
 0x263   : > { %v1569_v34 = vsel %vm1341_vm2, %v2738_v33, 0.0  ;;  %v1583_v35 = vpack.c.bf16 %v2738_v33, %v2738_v33  ;;  %2604 = vmatprep.subr.bf16.mxu0 %v2841_v1 }
 0x264   : > { %1570 = vadd.xlane.f32.xlu1 %v1569_v34 }
 0x265   : > { %2589 = vmatmul.mubr.msk.bf16.vlgmr.msra.gmra.mxu1 %vm1341_vm2, %v1583_v35 }
 0x266   : > { %v2740_v37 = vpop.eup %2739  ;;  %2599 = vmatpush3.bf16.msra.mxu1 %v1729_v36  ;;  %2600 = vmatprep.mubr.msk.bf16.mxu1 %vm2842_vm0, %v2841_v1 }
 0x267   : > { %v1572_v38 = vsel %vm1341_vm2, %v2740_v37, 0.0  ;;  %v1584_v39 = vpack.c.bf16 %v2740_v37, %v2740_v37  ;;  %2610 = vmatprep.subr.bf16.mxu1 %v2841_v1 }
 0x268   : > { %1573 = vadd.xlane.f32.xlu0 %v1572_v38 }
 0x269   : > { %2595 = vmatmul.mubr.msk.bf16.vlgmr.msra.gmra.mxu0 %vm1341_vm2, %v1584_v39 }
 0x26a   : > { %v2742_v40 = vpop.eup %2741  ;;  %2606 = vmatprep.mubr.msk.bf16.mxu0 %vm2842_vm0, %v2841_v1  ;;  %2605 = vmatpush3.bf16.msra.mxu0 %v1795_v44 }
 0x26b   : > { %v1575_v41 = vsel %vm1341_vm2, %v2742_v40, 0.0  ;;  %v1585_v42 = vpack.c.bf16 %v2742_v40, %v2742_v40  ;;  %2616 = vmatprep.subr.bf16.mxu0 %v2841_v1  ;;  %v2744_v55 = vpop.eup %2743 }
 0x26c   : > { %1576 = vadd.xlane.f32.xlu1 %v1575_v41  ;;  %v1562_v57 = vmul.f32 0.0, %v2744_v55  ;;  %v2746_v58 = vpop.eup %2745 }
 0x26d   : > { %2601 = vmatmul.mubr.msk.bf16.vlgmr.msra.gmra.mxu1 %vm1341_vm2, %v1585_v42  ;;  %v1563_v61 = vmul.f32 0.0, %v2746_v58  ;;  %v2748_v62 = vpop.eup %2747 }
 0x26e   : > { %2612 = vmatprep.mubr.msk.bf16.mxu1 %vm2842_vm0, %v2841_v1  ;;  %2611 = vmatpush3.bf16.msra.mxu1 %v1841_v46  ;;  %v1564_v2 = vmul.f32 0.0, %v2748_v62  ;;  %v2750_v3 = vpop.eup %2749 }
 0x26f   : > { %2622 = vmatprep.subr.bf16.mxu1 %v2841_v1  ;;  %v1565_v6 = vmul.f32 0.0, %v2750_v3 }
 0x2e9   : > { %v1568_v56 = vpop.xlane.xlu0 %1567 }
 0x2ea   : > { %v1578_v59 = vadd.f32 %v1568_v56, %v1562_v57 }
 0x2ec   : > { %2751 = vrcp.f32 %v1578_v59 }
 0x2ed   : > { %v1571_v60 = vpop.xlane.xlu1 %1570 }
 0x2ee   : > { %v1579_v63 = vadd.f32 %v1571_v60, %v1563_v61 }
 0x2f0   : > { %2753 = vrcp.f32 %v1579_v63  ;;  %v2373_v63 = vld [vmem:[%s3354_s7] ss:$0 sm:$0xff] }
 0x2f1   : > { %v1574_v0 = vpop.xlane.xlu0 %1573 }
 0x2f2   : > { %v1580_v4 = vadd.f32 %v1574_v0, %v1564_v2 }
 0x2f4   : > { %2755 = vrcp.f32 %v1580_v4  ;;  %v1990_v4 = vunpack.c.l.bf16 %v3019_v7  ;;  %v2730_v7 = vld [vmem:[%s3357_s10] sm:$0xff]  }
 0x2f5   : > { %v1577_v5 = vpop.xlane.xlu1 %1576 }
 0x2f6   : > { %v1581_v8 = vadd.f32 %v1577_v5, %v1565_v6 }
 0x2f8   : > { %2757 = vrcp.f32 %v1581_v8 }
 0x2f9   : > { %v2752_v11 = vpop.eup %2751 }
 0x2fd   : > { %v2754_v20 = vpop.eup %2753 }
 0x301   : > { %v2756_v30 = vpop.eup %2755 }
 0x305   : > { %v2758_v38 = vpop.eup %2757 }
 0x321   : > { %v1627_v9 = vpop.f32.mrf.mxu0 }
 0x322   : > { %v1771_v10 = vadd.f32 %v1627_v9, %v1562_v57 }
 0x323   : > { %v2584_v12 = vpop.f32.mrf.mxu0 }
 0x324   : > { %v1779_v14 = vmul.f32 %v2752_v11, %v1771_v10 }
 0x325   : > { %v1630_v15 = vpop.f32.mrf.mxu0  ;;  %v1673_v16 = vpop.f32.mrf.mxu1 }
 0x326   : > { %v1783_v17 = vpack.c.bf16 %v1779_v14, %v1779_v14  ;;  %v1772_v18 = vadd.f32 %v1673_v16, %v1563_v61  ;;  %v2729_v16 = vld [vmem:[%s3357_s10 + $0x8] sm:$0xff]  }
 0x327   : > { %v2585_v21 = vpop.f32.mrf.mxu0  ;;  %v2590_v22 = vpop.f32.mrf.mxu1 }
 0x328   : > { %v1780_v24 = vmul.f32 %v2754_v20, %v1772_v18  ;;  %2607 = vmatmul.mubr.msk.bf16.vlgmr.msra.gmra.mxu0 %vm1341_vm2, %v1783_v17  ;;  %v2731_v17 = vld [vmem:[%s3359_s12 + $0x18] sm:$0xff]   ;;  %v2732_v18 = vld [vmem:[%s3359_s12 + $0x10] sm:$0xff]  }
 0x329   : > { %v1676_v25 = vpop.f32.mrf.mxu1  ;;  %v1719_v26 = vpop.f32.mrf.mxu0  ;;  %2617 = vmatpush3.bf16.msra.mxu0 %v1887_v19  ;;  %2618 = vmatprep.mubr.msk.bf16.mxu0 %vm2842_vm0, %v2841_v1 }
 0x32a   : > { %v1784_v27 = vpack.c.bf16 %v1780_v24, %v1780_v24  ;;  %v1773_v28 = vadd.f32 %v1719_v26, %v1564_v2  ;;  %2628 = vmatprep.subr.bf16.mxu0 %v2841_v1  ;;  %v2375_v25 = vld [vmem:[%s3356_s9] ss:$0 sm:$0xff] }
 0x32b   : > { %v2591_v31 = vpop.f32.mrf.mxu1  ;;  %v2596_v32 = vpop.f32.mrf.mxu0 }
 0x32c   : > { %v1781_v33 = vmul.f32 %v2756_v30, %v1773_v28  ;;  %2613 = vmatmul.mubr.msk.bf16.vlgmr.msra.gmra.mxu1 %vm1341_vm2, %v1784_v27  ;;  %v2734_v30 = vld [vmem:[%s3359_s12] sm:$0xff]  }
 0x32d   : > { %v1722_v34 = vpop.f32.mrf.mxu0  ;;  %v1765_v35 = vpop.f32.mrf.mxu1  ;;  %2623 = vmatpush3.bf16.msra.mxu1 %v1933_v29  ;;  %2624 = vmatprep.mubr.msk.bf16.mxu1 %vm2842_vm0, %v2841_v1  ;;  %v2733_v29 = vld [vmem:[%s3359_s12 + $0x8] sm:$0xff]   ;;  %v2376_v31 = vld [vmem:[%s3358_s11] ss:$0 sm:$0xff] }
 0x32e   : > { %v1785_v36 = vpack.c.bf16 %v1781_v33, %v1781_v33  ;;  %v1774_v37 = vadd.f32 %v1765_v35, %v1565_v6  ;;  %2636 = vmatprep.subr.bf16.mxu1 %v2841_v1 }
 0x32f   : > { %v2597_v39 = vpop.f32.mrf.mxu0  ;;  %v2602_v40 = vpop.f32.mrf.mxu1 }
 0x330   : > { %v1782_v41 = vmul.f32 %v2758_v38, %v1774_v37  ;;  %2619 = vmatmul.mubr.msk.bf16.vlgmr.msra.gmra.mxu0 %vm1341_vm2, %v1785_v36 }
 0x331   : > { %v1768_v42 = vpop.f32.mrf.mxu1  ;;  %2632 = vmatprep.mubr.msk.bf16.mxu0 %vm2842_vm0, %v2841_v1  ;;  %2629 = vmatpush3.bf16.msra.mxu0 %v2729_v16 }
 0x332   : > { %v1786_v43 = vpack.c.bf16 %v1782_v41, %v1782_v41  ;;  %2630 = vmatprep.subr.bf16.mxu0 %v2841_v1 }
 0x333   : > { %v2603_v44 = vpop.f32.mrf.mxu1 }
 0x334   : > { %2625 = vmatmul.mubr.msk.bf16.vlgmr.msra.gmra.mxu1 %vm1341_vm2, %v1786_v43 }
 0x335   : > { %2644 = vmatprep.mubr.msk.bf16.mxu1 %vm2842_vm0, %v2841_v1  ;;  %2631 = vmatpush3.bf16.msra.mxu0 %v2730_v7 }
 0x336   : > { %2637 = vmatpush3.bf16.msra.mxu1 %v2731_v17 }
 0x337   : > { %2638 = vmatprep.subr.bf16.mxu1 %v2841_v1 }
 0x33a   : > { %2639 = vmatpush3.bf16.msra.mxu1 %v2732_v18 }
 0x33b   : > { %2640 = vmatprep.subr.bf16.mxu1 %v2841_v1 }
 0x33e   : > { %2641 = vmatpush3.bf16.msra.mxu1 %v2733_v29 }
 0x33f   : > { %2642 = vmatprep.subr.bf16.mxu1 %v2841_v1  ;;  %v2380_v1 = vld [vmem:[%s3360_s13] ss:$0 sm:$0xff] }
 0x342   : > { %2643 = vmatpush3.bf16.msra.mxu1 %v2734_v30 }
 0x3e8   : > { %v1831_v45 = vpop.f32.mrf.mxu0 }
 0x3e9   : > { %v1975_v54 = vsel %vm618_vm1, %v1831_v45, 0.0 }
 0x3ea   : > { %v2608_v46 = vpop.f32.mrf.mxu0 }
 0x3ec   : > { %v1834_v47 = vpop.f32.mrf.mxu0  ;;  %v1877_v48 = vpop.f32.mrf.mxu1 }
 0x3ed   : > { %v1976_v51 = vsel %vm618_vm1, %v1877_v48, 0.0 }
 0x3ee   : > { %v2609_v49 = vpop.f32.mrf.mxu0  ;;  %v2614_v50 = vpop.f32.mrf.mxu1  ;;  %v1977_v56 = vadd.f32 %v1976_v51, %v1975_v54 }
 0x3f0   : > { %v1880_v52 = vpop.f32.mrf.mxu1  ;;  %v1923_v53 = vpop.f32.mrf.mxu0 }
 0x3f1   : > { %v1978_v55 = vsel %vm618_vm1, %v1923_v53, 0.0 }
 0x3f2   : > { %v2615_v57 = vpop.f32.mrf.mxu1  ;;  %v2620_v58 = vpop.f32.mrf.mxu0  ;;  %v1979_v59 = vadd.f32 %v1978_v55, %v1977_v56  ;;  %v2386_v55 = vld [vmem:[%s3361_s14] ss:$0 sm:$0xff] }
 0x3f3   : > { %v2387_v57 = vld [vmem:[%s3362_s15] ss:$0 sm:$0xff] }
 0x3f4   : > { %v1926_v60 = vpop.f32.mrf.mxu0  ;;  %v1969_v61 = vpop.f32.mrf.mxu1 }
 0x3f5   : > { %v1980_v62 = vsel %vm618_vm1, %v1969_v61, 0.0 }
 0x3f6   : > { %v1981_v0 = vadd.f32 %v1980_v62, %v1979_v59  ;;  %v2621_v2 = vpop.f32.mrf.mxu0  ;;  %v2626_v3 = vpop.f32.mrf.mxu1 }
 0x3f8   : > { %v1989_v5 = vadd.f32 %v2373_v63, %v1981_v0  ;;  %v1972_v6 = vpop.f32.mrf.mxu1 }
 0x3fa   : > { %v2627_v8 = vpop.f32.mrf.mxu1  ;;  %v1991_v9 = vadd.f32 %v1990_v4, %v1989_v5 }
 0x3fc   : > { %v1994_v10 = vsel %vm618_vm1, %v1991_v9, 0.0 }
 0x3fd   : > { %1995 = vadd.xlane.f32.xlu0 %v1994_v10 }
 0x486   : > { %v1996_v11 = vpop.xlane.xlu0 %1995 }
 0x487   : > { %v1998_v12 = vmul.f32 0.03125, %v1996_v11 }
 0x489   : > { %v1999_v13 = vsub.f32 %v1991_v9, %v1998_v12 }
 0x48b   : > { %v2000_v14 = vmul.f32 %v1999_v13, %v1999_v13 }
 0x48d   : > { %v2001_v15 = vsel %vm618_vm1, %v2000_v14, 0.0 }
 0x48e   : > { %2002 = vadd.xlane.f32.xlu1 %v2001_v15 }
 0x517   : > { %v2003_v19 = vpop.xlane.xlu1 %2002 }
 0x518   : > { %v2004_v20 = vmul.f32 0.03125, %v2003_v19 }
 0x51a   : > { %v2005_v21 = vadd.f32 1e-05, %v2004_v20 }
 0x51c   : > { %2759 = vrsqrt.f32 %v2005_v21 }
 0x529   : > { %v2760_v22 = vpop.eup %2759 }
 0x52a   : > { %v2007_v24 = vmul.f32 %v2760_v22, %v1999_v13 }
 0x52c   : > { %v2014_v26 = vmul.f32 %v2374_v23, %v2007_v24 }
 0x52e   : > { %v2021_v27 = vadd.f32 %v2375_v25, %v2014_v26 }
 0x530   : > { %v2022_v28 = vpack.c.bf16 %v2021_v27, %v2021_v27 }
 0x532   : > { %2633 = vmatmul.mubr.msk.bf16.vlgmr.msra.gmra.mxu0 %vm618_vm1, %v2022_v28 }
 0x5f2   : > { %v2083_v32 = vpop.f32.mrf.mxu0 }
 0x5f3   : > { %v2084_v33 = vadd.f32 %v2376_v31, %v2083_v32 }
 0x5f4   : > { %v2634_v34 = vpop.f32.mrf.mxu0 }
 0x5f5   : > { %v2089_v35 = vmax.f32 %v2084_v33, 0.0 }
 0x5f6   : > { %v2086_v36 = vpop.f32.mrf.mxu0 }
 0x5f7   : > { %v2090_v37 = vpack.c.bf16 %v2089_v35, %v2089_v35 }
 0x5f8   : > { %v2635_v38 = vpop.f32.mrf.mxu0 }
 0x5f9   : > { %2645 = vmatmul.mubr.msk.bf16.vlgmr.msra.gmra.mxu1 %vm2130_vm4, %v2090_v37 }
 0x6b9   : > { %v2168_v39 = vpop.f32.mrf.mxu1 }
 0x6ba   : > { %v2169_v40 = vadd.f32 %v2380_v1, %v2168_v39 }
 0x6bb   : > { %v2646_v41 = vpop.f32.mrf.mxu1 }
 0x6bc   : > { %v2174_v42 = vadd.f32 %v2169_v40, %v2021_v27 }
 0x6bd   : > { %v2171_v43 = vpop.f32.mrf.mxu1 }
 0x6be   : > { %v2177_v44 = vsel %vm618_vm1, %v2174_v42, 0.0 }
 0x6bf   : > { %2178 = vadd.xlane.f32.xlu0 %v2177_v44  ;;  %v2647_v45 = vpop.f32.mrf.mxu1 }
 0x748   : > { %v2179_v46 = vpop.xlane.xlu0 %2178 }
 0x749   : > { %v2180_v47 = vmul.f32 0.03125, %v2179_v46 }
 0x74b   : > { %v2181_v48 = vsub.f32 %v2174_v42, %v2180_v47 }
 0x74d   : > { %v2182_v49 = vmul.f32 %v2181_v48, %v2181_v48 }
 0x74f   : > { %v2183_v50 = vsel %vm618_vm1, %v2182_v49, 0.0 }
 0x750   : > { %2184 = vadd.xlane.f32.xlu1 %v2183_v50 }
 0x7d9   : > { %v2185_v51 = vpop.xlane.xlu1 %2184 }
 0x7da   : > { %v2186_v52 = vmul.f32 0.03125, %v2185_v51 }
 0x7dc   : > { %v2187_v53 = vadd.f32 1e-05, %v2186_v52 }
 0x7de   : > { %2761 = vrsqrt.f32 %v2187_v53 }
 0x7eb   : > { %v2762_v54 = vpop.eup %2761 }
 0x7ec   : > { %v2189_v56 = vmul.f32 %v2762_v54, %v2181_v48 }
 0x7ee   : > { %v2196_v58 = vmul.f32 %v2386_v55, %v2189_v56 }
 0x7f0   : > { %v2203_v59 = vadd.f32 %v2387_v57, %v2196_v58 }
 0x7f2   : > { %v2204_v60 = vpack.c.bf16 %v2203_v59, %v2203_v59 }
 0x7f4   : > { %2206 = vst.msk [vmem:[%s547_s25] sm:$0xf] %vm2205_vm5, %v2204_v60 }
 0x7f5   : > { %2776 = shalt.err (!%p2773_p5)
}
 0x7f6   : > { %s2777_s17 = scalar_lea.hbm %s2220_s2, 64  ;;  %s2781_s28 = scalar_lea.hbm %s3363_s16, 128 }
 0x7f7   : > { %p2778_p6 = scmp.ne.s32.totalorder %s2220_s2, %s2777_s17  ;;  %p2782_p10 = scmp.lt.s32.totalorder %s2220_s2, %s3363_s16 }
 0x7f8   : > { %p2783_p11 = scmp.lt.s32.totalorder %s2781_s28, %s2777_s17 }
 0x7f9   : > { %p2779_p7 = pnand %p2778_p6, %p2969_p4 }
 0x7fa   : > { %p2784_p12 = por %p2783_p11, %p2782_p10 }
 0x7fb   : > { %p2780_p9 = pneg %p2779_p7 }
 0x7fd   : > { %p2785_p13 = pnand %p2784_p12, %p2780_p9 }
 0x7ff   : > { %2788 = shalt.err (!%p2785_p13)
}
 0x800   : > { %2648 = dma.vmem_to_hbm [thread:$0]  (%p2969_p4), %s2223_s23, 64, %s2220_s2, %s2208_s29  }
 0x801 PF: > { %p2654_p0 = scmp.ge.s32.totalorder %s2839_s26, 2  ;;  %s2234_s20 = sand.u32 1, %s2819_s21  }
 0x802   : > { %s2235_s27 = scalar_lea.sflag [#allocation3], %s2234_s20 }
 0x803   : > { %p2651_p1 = pnand %p2654_p0, %p2976_p8 }
 0x805   : > { %p2652_p2 = pneg %p2651_p1 }
 0x807   : > { %2814 = dma.done.wait (%p2652_p2), %s2235_s27, 64  }
 0x808   : > { %2816 = vsyncadd (%p2652_p2), %s2235_s27, 4294967232  ;;  %s29_s26 = sadd.s32 1, %s2839_s26   ;;  %s3382_s24 = sld [smem:[#allocation5_spill]] }
 0x809   : > { %p26_p3 = scmp.ge.s32.totalorder %s29_s26, 4   ;;  %s3383_s23 = sld [smem:[#allocation9_spill]] }
 0x80a   : > { %s3384_s0 = sld [smem:[#allocation6_spill]]  ;;  %s3386_s21 = smov %s2823_s22 }
 0x80b   : > { %s3385_s25 = sld [smem:[#allocation7_spill]] }
 0x80c   :  { %28 = sbr.rel (!%p26_p3) target bundleno = 8 (0x8), region = 122 }
 0x80e   : > { %s3387_s22 = smov %s3382_s24 }
 0x810   : > { %s3388_s24 = smov %s3384_s0 }
 0x811   :  { %2240 = vsyncpa [#allocation3], 1 }
 0x812   :  { %2242 = vsyncpa [#allocation3 + $0x1], 1 }

</bundles_post_ra>
